<compile_context>
chip_gen: v6e
topology: v6e:2x2x1
jax: 0.10.0
libtpu: 0.0.40
codegen_flags: <defaults>
</compile_context>

<pallas_src>
import functools

import jax
import jax.numpy as jnp
from jax.experimental import pallas as pl
from jax.experimental.pallas import tpu as pltpu

BN_EPS = 1e-5
_MAX_TILE_R = 2048  # upper bound on rows per grid step (multiple of 8)


def _round_up(x, m):
    return ((x + m - 1) // m) * m


def _vmem_limit_bytes():
    """Generation-aware VMEM cap (v7x: 64 MiB physical vs 128 MiB on v5e/v6e)."""
    phys = 64 << 20
    try:
        info = pltpu.get_tpu_info()
        phys = int(getattr(info, "vmem_capacity_bytes", phys) or phys)
    except Exception:
        pass
    return int(min(48 << 20, max(16 << 20, phys // 2)))


def _pick_tile_r(r_dim, k_pad, cout_pad, vmem_limit):
    """Biggest row tile whose double-buffered blocks fit comfortably in VMEM."""
    # Resident operands (weights + scale/shift), conservatively counted double-buffered.
    resident = 2 * k_pad * cout_pad * 2 + 2 * 2 * cout_pad * 4
    budget = max(1 << 20, vmem_limit - resident - (4 << 20))   # leave headroom
    per_row = 2 * (k_pad * 2 + cout_pad * 4)                   # dbl-buffered patches(bf16)+out(f32)
    rows = max(8, min(_MAX_TILE_R, budget // per_row))
    rows = min(rows, _round_up(r_dim, 8))
    return max(8, (rows // 8) * 8)


# ---------------------------------------------------------------------------
# Kernels
# ---------------------------------------------------------------------------
def _conv_stats_kernel(patches_ref, w_ref, sum_ref, sumsq_ref):
    """Pass A: conv GEMM per R-tile; accumulate per-channel sum / sum-of-squares."""
    @pl.when(pl.program_id(0) == 0)
    def _():
        sum_ref[...] = jnp.zeros_like(sum_ref)
        sumsq_ref[...] = jnp.zeros_like(sumsq_ref)

    y = jnp.dot(patches_ref[...], w_ref[...],
                preferred_element_type=jnp.float32)           # (tile_R, Cout_pad) f32
    # Cross-sublane reductions go to the XLU and overlap with the MXU of the next tile.
    sum_ref[...] += jnp.sum(y, axis=0, keepdims=True)
    sumsq_ref[...] += jnp.sum(y * y, axis=0, keepdims=True)


def _conv_bn_relu_kernel(patches_ref, w_ref, scale_ref, shift_ref, out_ref):
    """Pass B: conv GEMM per R-tile; fused BN (one FMA) + ReLU; lane-dense store."""
    y = jnp.dot(patches_ref[...], w_ref[...],
                preferred_element_type=jnp.float32)           # (tile_R, Cout_pad) f32
    out_ref[...] = jnp.maximum(y * scale_ref[...] + shift_ref[...], 0.0)


# ---------------------------------------------------------------------------
# JAX glue (im2col) + wrapper
# ---------------------------------------------------------------------------
def _im2col_3d(x, k, stride, padding, dilation):
    """x: (N, Cin, D, H, W) -> patches (N*Do*Ho*Wo, Cin*k^3), plus output spatial dims."""
    n, cin, d, h, w = x.shape
    xp = jnp.pad(x, ((0, 0), (0, 0),
                     (padding, padding), (padding, padding), (padding, padding)))
    do = (d + 2 * padding - dilation * (k - 1) - 1) // stride + 1
    ho = (h + 2 * padding - dilation * (k - 1) - 1) // stride + 1
    wo = (w + 2 * padding - dilation * (k - 1) - 1) // stride + 1

    slabs = []
    for kd in range(k):
        for kh in range(k):
            for kw in range(k):
                slabs.append(xp[:, :,
                                kd * dilation: kd * dilation + stride * do: stride,
                                kh * dilation: kh * dilation + stride * ho: stride,
                                kw * dilation: kw * dilation + stride * wo: stride])
    # (N, Cin, k^3, Do, Ho, Wo) -> (N, Do, Ho, Wo, Cin, k^3) -> (R, Cin*k^3)
    # Column order (cin-major, then kd,kh,kw) matches PyTorch Conv3d weight flattening.
    patches = jnp.stack(slabs, axis=2)
    patches = patches.transpose(0, 3, 4, 5, 1, 2)
    patches = patches.reshape(n * do * ho * wo, cin * k * k * k)
    return patches, (do, ho, wo)


@functools.partial(jax.jit,
                   static_argnames=("kernel_size", "stride", "padding", "dilation"))
def basic_conv_forward(x, weight, gamma, beta, *, kernel_size, stride=1,
                       padding=0, dilation=1):
    """BasicConv.forward (groups=1, bias=False, bn=True, relu=True) on NCDHW input.

    x:      (N, Cin, D, H, W) float32
    weight: (Cout, Cin, k, k, k)
    gamma, beta: (Cout,) BatchNorm affine parameters.
    Returns (N, Cout, Do, Ho, Wo) float32.
    """
    n = x.shape[0]
    cout = weight.shape[0]
    k = kernel_size

    patches, (do, ho, wo) = _im2col_3d(x, k, stride, padding, dilation)
    r_dim, k_dim = patches.shape

    # Lane/MXU-friendly padding and row tiling.
    k_pad = _round_up(k_dim, 128)
    cout_pad = _round_up(cout, 128)
    vmem_limit = _vmem_limit_bytes()
    tile_r = _pick_tile_r(r_dim, k_pad, cout_pad, vmem_limit)
    r_pad = _round_up(r_dim, tile_r)
    num_r_tiles = r_pad // tile_r

    # bf16 GEMM operands (f32 accumulation inside the kernel).  Zero padding keeps both
    # the matmul and the batch statistics exact: padded rows/cols contribute nothing,
    # and the stats are divided by the true R below.
    patches_p = jnp.pad(patches,
                        ((0, r_pad - r_dim), (0, k_pad - k_dim))).astype(jnp.bfloat16)
    w_mat = weight.reshape(cout, k_dim).T.astype(jnp.float32)       # (K, Cout)
    w_p = jnp.pad(w_mat,
                  ((0, k_pad - k_dim), (0, cout_pad - cout))).astype(jnp.bfloat16)

    # ---- Pass A: per-channel sum / sum-of-squares of the conv output ----
    sums, sumsqs = pl.pallas_call(
        _conv_stats_kernel,
        out_shape=(jax.ShapeDtypeStruct((1, cout_pad), jnp.float32),
                   jax.ShapeDtypeStruct((1, cout_pad), jnp.float32)),
        grid=(num_r_tiles,),
        in_specs=[
            pl.BlockSpec((tile_r, k_pad), lambda r: (r, 0)),
            pl.BlockSpec((k_pad, cout_pad), lambda r: (0, 0)),      # resident weights
        ],
        out_specs=(
            pl.BlockSpec((1, cout_pad), lambda r: (0, 0)),          # resident accumulators
            pl.BlockSpec((1, cout_pad), lambda r: (0, 0)),
        ),
        compiler_params=pltpu.CompilerParams(
            dimension_semantics=("arbitrary",),
            vmem_limit_bytes=vmem_limit),
    )(patches_p, w_p)

    # Fold BatchNorm (training-mode, biased batch variance) into one scale/shift FMA.
    mean = sums[0, :cout] / r_dim
    var = jnp.maximum(sumsqs[0, :cout] / r_dim - mean * mean, 0.0)
    scale = gamma.astype(jnp.float32) * jax.lax.rsqrt(var + BN_EPS)
    shift = beta.astype(jnp.float32) - mean * scale
    scale_p = jnp.pad(scale[None, :], ((0, 0), (0, cout_pad - cout)))
    shift_p = jnp.pad(shift[None, :], ((0, 0), (0, cout_pad - cout)))

    # ---- Pass B: conv GEMM + fused BN + ReLU, tiled & pipelined over R ----
    out_flat = pl.pallas_call(
        _conv_bn_relu_kernel,
        out_shape=jax.ShapeDtypeStruct((r_pad, cout_pad), jnp.float32),
        grid=(num_r_tiles,),
        in_specs=[
            pl.BlockSpec((tile_r, k_pad), lambda r: (r, 0)),
            pl.BlockSpec((k_pad, cout_pad), lambda r: (0, 0)),      # resident weights
            pl.BlockSpec((1, cout_pad), lambda r: (0, 0)),          # resident scale
            pl.BlockSpec((1, cout_pad), lambda r: (0, 0)),          # resident shift
        ],
        out_specs=pl.BlockSpec((tile_r, cout_pad), lambda r: (r, 0)),
        compiler_params=pltpu.CompilerParams(
            dimension_semantics=("parallel",),                      # 2x on v7x megacore
            vmem_limit_bytes=vmem_limit),
    )(patches_p, w_p, scale_p, shift_p)

    # (R, Cout) -> (N, Do, Ho, Wo, Cout) -> (N, Cout, Do, Ho, Wo)
    out = out_flat[:r_dim, :cout].reshape(n, do, ho, wo, cout)
    return out.transpose(0, 4, 1, 2, 3)


def _reference(x, weight, gamma, beta, *, stride, padding, dilation):
    """Plain-JAX reference (Conv3d + training-mode BN + ReLU) for sanity check."""
    y = jax.lax.conv_general_dilated(
        x, weight,
        window_strides=(stride,) * 3,
        padding=[(padding, padding)] * 3,
        rhs_dilation=(dilation,) * 3,
        dimension_numbers=("NCDHW", "OIDHW", "NCDHW"),
        precision=jax.lax.Precision.HIGHEST,
    )
    mean = jnp.mean(y, axis=(0, 2, 3, 4), keepdims=True)
    var = jnp.mean((y - mean) ** 2, axis=(0, 2, 3, 4), keepdims=True)
    y = (y - mean) * jax.lax.rsqrt(var + BN_EPS)
    y = y * gamma.reshape(1, -1, 1, 1, 1) + beta.reshape(1, -1, 1, 1, 1)
    return jnp.maximum(y, 0.0)


if __name__ == "__main__":
    # Small shapes consistent with BasicConv(in_planes=4, out_planes=8,
    # kernel_size=3, stride=1, padding=1) applied to a 5-D NCDHW tensor.
    N, CIN, COUT = 2, 4, 8
    D = H = W = 8
    K, STRIDE, PAD, DIL = 3, 1, 1, 1

    key = jax.random.PRNGKey(0)
    kx, kw, kg, kb = jax.random.split(key, 4)
    x = jax.random.normal(kx, (N, CIN, D, H, W), dtype=jnp.float32)
    weight = jax.random.normal(kw, (COUT, CIN, K, K, K), dtype=jnp.float32) * 0.1
    gamma = 1.0 + 0.1 * jax.random.normal(kg, (COUT,), dtype=jnp.float32)
    beta = 0.1 * jax.random.normal(kb, (COUT,), dtype=jnp.float32)

    out = basic_conv_forward(x, weight, gamma, beta,
                             kernel_size=K, stride=STRIDE,
                             padding=PAD, dilation=DIL)
    out = jax.block_until_ready(out)

    ref = _reference(x, weight, gamma, beta,
                     stride=STRIDE, padding=PAD, dilation=DIL)
    assert out.shape == ref.shape == (N, COUT, D, H, W)
    # bf16 GEMM operands -> slightly looser tolerance than pure f32.
    assert jnp.allclose(out, ref, atol=3e-2, rtol=3e-2), "mismatch vs reference"

    print("KERNEL_OK")
</pallas_src>

<mosaic_0001>
module attributes {stable_mosaic.version = 11 : i64} {
  func.func @_conv_stats_kernel(%arg0: i32, %arg1: memref<1024x128xbf16, #tpu.memory_space<vmem>>, %arg2: memref<128x128xbf16, #tpu.memory_space<vmem>>, %arg3: memref<1x128xf32, #tpu.memory_space<vmem>>, %arg4: memref<1x128xf32, #tpu.memory_space<vmem>>) attributes {dimension_semantics = [#tpu.dimension_semantics<arbitrary>], iteration_bounds = array<i64: 1>, scalar_prefetch = 0 : i64, scratch_operands = 0 : i64, tpu.core_type = #tpu.core_type<tc>, window_params = [{transform_indices = @transform_0, window_bounds = array<i64: 1024, 128>}, {pipeline_mode = #tpu.pipeline_mode<synchronous>, transform_indices = @transform_1, window_bounds = array<i64: 128, 128>}, {pipeline_mode = #tpu.pipeline_mode<synchronous>, transform_indices = @transform_2, window_bounds = array<i64: 1, 128>}, {pipeline_mode = #tpu.pipeline_mode<synchronous>, transform_indices = @transform_3, window_bounds = array<i64: 1, 128>}]} {
    %c0_i32 = arith.constant 0 : i32
    %0 = arith.cmpi eq, %arg0, %c0_i32 : i32
    %1 = arith.extui %0 : i1 to i32
    %c0_i32_0 = arith.constant 0 : i32
    %2 = arith.cmpi ne, %1, %c0_i32_0 : i32
    scf.if %2 {
      %cst_14 = arith.constant 0.000000e+00 : f32
      %17 = vector.broadcast %cst_14 : f32 to vector<1x128xf32>
      %c0_15 = arith.constant 0 : index
      %c0_16 = arith.constant 0 : index
      %18 = vector.load %arg3[%c0_15, %c0_16] : memref<1x128xf32, #tpu.memory_space<vmem>>, vector<1x128xf32>
      tpu.vector_store %arg3[%c0_15, %c0_16], %17 {strides = array<i32>} : memref<1x128xf32, #tpu.memory_space<vmem>>, vector<1x128xf32>,
      %cst_17 = arith.constant 0.000000e+00 : f32
      %19 = vector.broadcast %cst_17 : f32 to vector<1x128xf32>
      %c0_18 = arith.constant 0 : index
      %c0_19 = arith.constant 0 : index
      %20 = vector.load %arg4[%c0_18, %c0_19] : memref<1x128xf32, #tpu.memory_space<vmem>>, vector<1x128xf32>
      tpu.vector_store %arg4[%c0_18, %c0_19], %19 {strides = array<i32>} : memref<1x128xf32, #tpu.memory_space<vmem>>, vector<1x128xf32>,
    } else {
    }
    %c0 = arith.constant 0 : index
    %c0_1 = arith.constant 0 : index
    %3 = vector.load %arg1[%c0, %c0_1] : memref<1024x128xbf16, #tpu.memory_space<vmem>>, vector<1024x128xbf16>
    %c0_2 = arith.constant 0 : index
    %c0_3 = arith.constant 0 : index
    %4 = vector.load %arg2[%c0_2, %c0_3] : memref<128x128xbf16, #tpu.memory_space<vmem>>, vector<128x128xbf16>
    %cst = arith.constant dense<0.000000e+00> : vector<1024x128xf32>
    %5 = tpu.matmul %3, %4, %cst {dimension_numbers = #tpu.dot_dimension_numbers<[1], [0], [0], [1], [0, 0, 1, 1], [], []>} : vector<1024x128xbf16>, vector<128x128xbf16>, vector<1024x128xf32> -> vector<1024x128xf32>
    %c0_4 = arith.constant 0 : index
    %c0_5 = arith.constant 0 : index
    %6 = vector.load %arg3[%c0_4, %c0_5] : memref<1x128xf32, #tpu.memory_space<vmem>>, vector<1x128xf32>
    %cst_6 = arith.constant dense<0.000000e+00> : vector<128xf32>
    %7 = vector.multi_reduction <add>, %5, %cst_6 [0] : vector<1024x128xf32> to vector<128xf32>
    %8 = vector.shape_cast %7 : vector<128xf32> to vector<1x128xf32>
    %9 = arith.addf %6, %8 : vector<1x128xf32>
    %c0_7 = arith.constant 0 : index
    %c0_8 = arith.constant 0 : index
    %10 = vector.load %arg3[%c0_7, %c0_8] : memref<1x128xf32, #tpu.memory_space<vmem>>, vector<1x128xf32>
    tpu.vector_store %arg3[%c0_7, %c0_8], %9 {strides = array<i32>} : memref<1x128xf32, #tpu.memory_space<vmem>>, vector<1x128xf32>,
    %c0_9 = arith.constant 0 : index
    %c0_10 = arith.constant 0 : index
    %11 = vector.load %arg4[%c0_9, %c0_10] : memref<1x128xf32, #tpu.memory_space<vmem>>, vector<1x128xf32>
    %12 = arith.mulf %5, %5 : vector<1024x128xf32>
    %cst_11 = arith.constant dense<0.000000e+00> : vector<128xf32>
    %13 = vector.multi_reduction <add>, %12, %cst_11 [0] : vector<1024x128xf32> to vector<128xf32>
    %14 = vector.shape_cast %13 : vector<128xf32> to vector<1x128xf32>
    %15 = arith.addf %11, %14 : vector<1x128xf32>
    %c0_12 = arith.constant 0 : index
    %c0_13 = arith.constant 0 : index
    %16 = vector.load %arg4[%c0_12, %c0_13] : memref<1x128xf32, #tpu.memory_space<vmem>>, vector<1x128xf32>
    tpu.vector_store %arg4[%c0_12, %c0_13], %15 {strides = array<i32>} : memref<1x128xf32, #tpu.memory_space<vmem>>, vector<1x128xf32>,
    return
  }
  func.func @transform_0(%arg0: i32) -> (i32, i32) {
    %c0_i32 = arith.constant 0 : i32
    %c0_i32_0 = arith.constant 0 : i32
    return %arg0, %c0_i32 : i32, i32
  }
  func.func @transform_1(%arg0: i32) -> (i32, i32) {
    %c0_i32 = arith.constant 0 : i32
    %c0_i32_0 = arith.constant 0 : i32
    %c0_i32_1 = arith.constant 0 : i32
    return %c0_i32, %c0_i32_0 : i32, i32
  }
  func.func @transform_2(%arg0: i32) -> (i32, i32) {
    %c0_i32 = arith.constant 0 : i32
    %c0_i32_0 = arith.constant 0 : i32
    %c0_i32_1 = arith.constant 0 : i32
    return %c0_i32, %c0_i32_0 : i32, i32
  }
  func.func @transform_3(%arg0: i32) -> (i32, i32) {
    %c0_i32 = arith.constant 0 : i32
    %c0_i32_0 = arith.constant 0 : i32
    %c0_i32_1 = arith.constant 0 : i32
    return %c0_i32, %c0_i32_0 : i32, i32
  }
}

module attributes {stable_mosaic.version = 11 : i64} {
  func.func @_conv_bn_relu_kernel(%arg0: i32, %arg1: memref<1024x128xbf16, #tpu.memory_space<vmem>>, %arg2: memref<128x128xbf16, #tpu.memory_space<vmem>>, %arg3: memref<1x128xf32, #tpu.memory_space<vmem>>, %arg4: memref<1x128xf32, #tpu.memory_space<vmem>>, %arg5: memref<1024x128xf32, #tpu.memory_space<vmem>>) attributes {dimension_semantics = [#tpu.dimension_semantics<parallel>], iteration_bounds = array<i64: 1>, scalar_prefetch = 0 : i64, scratch_operands = 0 : i64, tpu.core_type = #tpu.core_type<tc>, window_params = [{transform_indices = @transform_0, window_bounds = array<i64: 1024, 128>}, {pipeline_mode = #tpu.pipeline_mode<synchronous>, transform_indices = @transform_1, window_bounds = array<i64: 128, 128>}, {pipeline_mode = #tpu.pipeline_mode<synchronous>, transform_indices = @transform_2, window_bounds = array<i64: 1, 128>}, {pipeline_mode = #tpu.pipeline_mode<synchronous>, transform_indices = @transform_3, window_bounds = array<i64: 1, 128>}, {transform_indices = @transform_4, window_bounds = array<i64: 1024, 128>}]} {
    %c0 = arith.constant 0 : index
    %c0_0 = arith.constant 0 : index
    %0 = vector.load %arg1[%c0, %c0_0] : memref<1024x128xbf16, #tpu.memory_space<vmem>>, vector<1024x128xbf16>
    %c0_1 = arith.constant 0 : index
    %c0_2 = arith.constant 0 : index
    %1 = vector.load %arg2[%c0_1, %c0_2] : memref<128x128xbf16, #tpu.memory_space<vmem>>, vector<128x128xbf16>
    %cst = arith.constant dense<0.000000e+00> : vector<1024x128xf32>
    %2 = tpu.matmul %0, %1, %cst {dimension_numbers = #tpu.dot_dimension_numbers<[1], [0], [0], [1], [0, 0, 1, 1], [], []>} : vector<1024x128xbf16>, vector<128x128xbf16>, vector<1024x128xf32> -> vector<1024x128xf32>
    %c0_3 = arith.constant 0 : index
    %c0_4 = arith.constant 0 : index
    %3 = vector.load %arg3[%c0_3, %c0_4] : memref<1x128xf32, #tpu.memory_space<vmem>>, vector<1x128xf32>
    %4 = vector.broadcast %3 : vector<1x128xf32> to vector<1024x128xf32>
    %5 = arith.mulf %2, %4 : vector<1024x128xf32>
    %c0_5 = arith.constant 0 : index
    %c0_6 = arith.constant 0 : index
    %6 = vector.load %arg4[%c0_5, %c0_6] : memref<1x128xf32, #tpu.memory_space<vmem>>, vector<1x128xf32>
    %7 = vector.broadcast %6 : vector<1x128xf32> to vector<1024x128xf32>
    %8 = arith.addf %5, %7 : vector<1024x128xf32>
    %cst_7 = arith.constant 0.000000e+00 : f32
    %9 = vector.broadcast %cst_7 : f32 to vector<1024x128xf32>
    %10 = arith.maximumf %8, %9 : vector<1024x128xf32>
    %c0_8 = arith.constant 0 : index
    %c0_9 = arith.constant 0 : index
    %11 = vector.load %arg5[%c0_8, %c0_9] : memref<1024x128xf32, #tpu.memory_space<vmem>>, vector<1024x128xf32>
    tpu.vector_store %arg5[%c0_8, %c0_9], %10 {strides = array<i32>} : memref<1024x128xf32, #tpu.memory_space<vmem>>, vector<1024x128xf32>,
    return
  }
  func.func @transform_0(%arg0: i32) -> (i32, i32) {
    %c0_i32 = arith.constant 0 : i32
    %c0_i32_0 = arith.constant 0 : i32
    return %arg0, %c0_i32 : i32, i32
  }
  func.func @transform_1(%arg0: i32) -> (i32, i32) {
    %c0_i32 = arith.constant 0 : i32
    %c0_i32_0 = arith.constant 0 : i32
    %c0_i32_1 = arith.constant 0 : i32
    return %c0_i32, %c0_i32_0 : i32, i32
  }
  func.func @transform_2(%arg0: i32) -> (i32, i32) {
    %c0_i32 = arith.constant 0 : i32
    %c0_i32_0 = arith.constant 0 : i32
    %c0_i32_1 = arith.constant 0 : i32
    return %c0_i32, %c0_i32_0 : i32, i32
  }
  func.func @transform_3(%arg0: i32) -> (i32, i32) {
    %c0_i32 = arith.constant 0 : i32
    %c0_i32_0 = arith.constant 0 : i32
    %c0_i32_1 = arith.constant 0 : i32
    return %c0_i32, %c0_i32_0 : i32, i32
  }
  func.func @transform_4(%arg0: i32) -> (i32, i32) {
    %c0_i32 = arith.constant 0 : i32
    %c0_i32_0 = arith.constant 0 : i32
    return %arg0, %c0_i32 : i32, i32
  }
}

</mosaic_0001>

<bundles_post_ra>
// kernel: basic_conv_forward.2
= control target key start
LH: loop header
LB: loop body
LE: loop exit
PB: predicated region body
PF: predicated region fallthrough
CT: control target
= control target key end

     0   :  { %s2421_s1 = inlined_call_operand.vmem [shape: bf16[128,128], index: 1, kind: input, shape index: {}]   ;;  %s2422_s0 = inlined_call_operand.vmem [shape: bf16[1024,128], index: 0, kind: input, shape index: {}]   ;;  %s2423_s2 = inlined_call_operand.vmem [shape: f32[1,128], index: 2, kind: output, shape index: {0}]   ;;  %s2424_s3 = inlined_call_operand.vmem [shape: f32[1,128], index: 3, kind: output, shape index: {1}]  }
   0x1   :  { %v1854_v0 = vld [vmem:[%s2421_s1 + $0x38] sm:$0xff]   ;;  %v1855_v1 = vld [vmem:[%s2421_s1 + $0x30] sm:$0xff]   ;;  %v1856_v2 = vld [vmem:[%s2421_s1 + $0x28] sm:$0xff]  }
   0x2   :  { %1693 = vmatprep.subr.bf16.mxu0 %v1854_v0  ;;  %1837 = vmatprep.subr.bf16.mxu1 %v1854_v0  ;;  %v1857_v3 = vld [vmem:[%s2421_s1 + $0x20] sm:$0xff]   ;;  %v1858_v5 = vld [vmem:[%s2421_s1 + $0x18] sm:$0xff]   ;;  %v1859_v6 = vld [vmem:[%s2421_s1 + $0x10] sm:$0xff]  }
   0x3   :  { %1694 = vmatpush3.bf16.msra.mxu0 %v1854_v0  ;;  %1845 = vmatpush3.bf16.msra.mxu1 %v1854_v0  ;;  %v1862_v4 = vld [vmem:[%s2422_s0] sm:$0xff]   ;;  %v1860_v7 = vld [vmem:[%s2421_s1 + $0x8] sm:$0xff]   ;;  %v1864_v10 = vld [vmem:[%s2422_s0 + $0x10] sm:$0xff]  }
   0x4   :  { %1695 = vmatprep.subr.bf16.mxu0 %v1855_v1  ;;  %1838 = vmatprep.subr.bf16.mxu1 %v1855_v1  ;;  %v1861_v8 = vld [vmem:[%s2421_s1] sm:$0xff]   ;;  %v1863_v9 = vld [vmem:[%s2422_s0 + $0x8] sm:$0xff]   ;;  %v1865_v11 = vld [vmem:[%s2422_s0 + $0x18] sm:$0xff]  }
   0x5   :  { %1709 = vmatprep.mubr.bf16.mxu0 %v1862_v4  ;;  %v1866_v12 = vld [vmem:[%s2422_s0 + $0x20] sm:$0xff]   ;;  %v1895_v14 = vld [vmem:[%s2422_s0 + $0x108] sm:$0xff]   ;;  %v1896_v15 = vld [vmem:[%s2422_s0 + $0x110] sm:$0xff]  }
   0x6   :  { %v1894_v13 = vld [vmem:[%s2422_s0 + $0x100] sm:$0xff]   ;;  %v1867_v16 = vld [vmem:[%s2422_s0 + $0x28] sm:$0xff]   ;;  %v1868_v17 = vld [vmem:[%s2422_s0 + $0x30] sm:$0xff]  }
   0x7   :  { %1696 = vmatpush3.bf16.msra.mxu0 %v1855_v1  ;;  %1846 = vmatpush3.bf16.msra.mxu1 %v1855_v1  ;;  %v1897_v18 = vld [vmem:[%s2422_s0 + $0x118] sm:$0xff]   ;;  %v1898_v19 = vld [vmem:[%s2422_s0 + $0x120] sm:$0xff]   ;;  %v1899_v22 = vld [vmem:[%s2422_s0 + $0x128] sm:$0xff]  }
   0x8   :  { %1697 = vmatprep.subr.bf16.mxu0 %v1856_v2  ;;  %1839 = vmatprep.subr.bf16.mxu1 %v1856_v2  ;;  %v1869_v20 = vld [vmem:[%s2422_s0 + $0x38] sm:$0xff]   ;;  %v1870_v21 = vld [vmem:[%s2422_s0 + $0x40] sm:$0xff]   ;;  %v1900_v23 = vld [vmem:[%s2422_s0 + $0x130] sm:$0xff]  }
   0x9   :  { %1773 = vmatprep.mubr.bf16.mxu1 %v1894_v13  ;;  %v1871_v24 = vld [vmem:[%s2422_s0 + $0x48] sm:$0xff]   ;;  %v1872_v25 = vld [vmem:[%s2422_s0 + $0x50] sm:$0xff]   ;;  %v1901_v26 = vld [vmem:[%s2422_s0 + $0x138] sm:$0xff]  }
   0xa   :  { %v1902_v27 = vld [vmem:[%s2422_s0 + $0x140] sm:$0xff]   ;;  %v1873_v28 = vld [vmem:[%s2422_s0 + $0x58] sm:$0xff]   ;;  %v1903_v30 = vld [vmem:[%s2422_s0 + $0x148] sm:$0xff]  }
   0xb   :  { %1698 = vmatpush3.bf16.msra.mxu0 %v1856_v2  ;;  %1847 = vmatpush3.bf16.msra.mxu1 %v1856_v2  ;;  %v1874_v29 = vld [vmem:[%s2422_s0 + $0x60] sm:$0xff]   ;;  %v1904_v31 = vld [vmem:[%s2422_s0 + $0x150] sm:$0xff]   ;;  %v1875_v32 = vld [vmem:[%s2422_s0 + $0x68] sm:$0xff]  }
   0xc   :  { %1699 = vmatprep.subr.bf16.mxu0 %v1857_v3  ;;  %1840 = vmatprep.subr.bf16.mxu1 %v1857_v3  ;;  %v1876_v33 = vld [vmem:[%s2422_s0 + $0x70] sm:$0xff]   ;;  %v1905_v34 = vld [vmem:[%s2422_s0 + $0x158] sm:$0xff]   ;;  %v1906_v35 = vld [vmem:[%s2422_s0 + $0x160] sm:$0xff]  }
   0xd   :  { %v1877_v36 = vld [vmem:[%s2422_s0 + $0x78] sm:$0xff]   ;;  %v1878_v37 = vld [vmem:[%s2422_s0 + $0x80] sm:$0xff]   ;;  %v1907_v38 = vld [vmem:[%s2422_s0 + $0x168] sm:$0xff]  }
   0xe   :  { %v1908_v39 = vld [vmem:[%s2422_s0 + $0x170] sm:$0xff]   ;;  %v1879_v40 = vld [vmem:[%s2422_s0 + $0x88] sm:$0xff]   ;;  %v1909_v42 = vld [vmem:[%s2422_s0 + $0x178] sm:$0xff]  }
   0xf   :  { %1700 = vmatpush3.bf16.msra.mxu0 %v1857_v3  ;;  %1848 = vmatpush3.bf16.msra.mxu1 %v1857_v3  ;;  %v1880_v41 = vld [vmem:[%s2422_s0 + $0x90] sm:$0xff]   ;;  %v1910_v43 = vld [vmem:[%s2422_s0 + $0x180] sm:$0xff]   ;;  %v1881_v44 = vld [vmem:[%s2422_s0 + $0x98] sm:$0xff]  }
  0x10   :  { %1701 = vmatprep.subr.bf16.mxu0 %v1858_v5  ;;  %1841 = vmatprep.subr.bf16.mxu1 %v1858_v5  ;;  %v1882_v45 = vld [vmem:[%s2422_s0 + $0xa0] sm:$0xff]   ;;  %v1911_v46 = vld [vmem:[%s2422_s0 + $0x188] sm:$0xff]   ;;  %v1912_v47 = vld [vmem:[%s2422_s0 + $0x190] sm:$0xff]  }
  0x11   :  { %v1883_v48 = vld [vmem:[%s2422_s0 + $0xa8] sm:$0xff]   ;;  %v1884_v49 = vld [vmem:[%s2422_s0 + $0xb0] sm:$0xff]   ;;  %v1913_v50 = vld [vmem:[%s2422_s0 + $0x198] sm:$0xff]  }
  0x12   :  { %v1914_v51 = vld [vmem:[%s2422_s0 + $0x1a0] sm:$0xff]   ;;  %v1885_v52 = vld [vmem:[%s2422_s0 + $0xb8] sm:$0xff]   ;;  %v1915_v54 = vld [vmem:[%s2422_s0 + $0x1a8] sm:$0xff]  }
  0x13   :  { %1702 = vmatpush3.bf16.msra.mxu0 %v1858_v5  ;;  %1849 = vmatpush3.bf16.msra.mxu1 %v1858_v5  ;;  %v1886_v53 = vld [vmem:[%s2422_s0 + $0xc0] sm:$0xff]   ;;  %v1916_v55 = vld [vmem:[%s2422_s0 + $0x1b0] sm:$0xff]   ;;  %v1887_v56 = vld [vmem:[%s2422_s0 + $0xc8] sm:$0xff]  }
  0x14   :  { %1703 = vmatprep.subr.bf16.mxu0 %v1859_v6  ;;  %1842 = vmatprep.subr.bf16.mxu1 %v1859_v6  ;;  %v1888_v57 = vld [vmem:[%s2422_s0 + $0xd0] sm:$0xff]   ;;  %v1917_v58 = vld [vmem:[%s2422_s0 + $0x1b8] sm:$0xff]   ;;  %v1918_v59 = vld [vmem:[%s2422_s0 + $0x1c0] sm:$0xff]  }
  0x15   :  { %v1889_v60 = vld [vmem:[%s2422_s0 + $0xd8] sm:$0xff]   ;;  %v1890_v61 = vld [vmem:[%s2422_s0 + $0xe0] sm:$0xff]   ;;  %v1919_v62 = vld [vmem:[%s2422_s0 + $0x1c8] sm:$0xff]  }
  0x16   :  { %v1920_v63 = vld [vmem:[%s2422_s0 + $0x1d0] sm:$0xff]   ;;  %v1891_v0 = vld [vmem:[%s2422_s0 + $0xe8] sm:$0xff]   ;;  %v1921_v2 = vld [vmem:[%s2422_s0 + $0x1d8] sm:$0xff]  }
  0x17   :  { %1704 = vmatpush3.bf16.msra.mxu0 %v1859_v6  ;;  %1850 = vmatpush3.bf16.msra.mxu1 %v1859_v6  ;;  %v1892_v1 = vld [vmem:[%s2422_s0 + $0xf0] sm:$0xff]   ;;  %v1922_v3 = vld [vmem:[%s2422_s0 + $0x1e0] sm:$0xff]   ;;  %v1893_v4 = vld [vmem:[%s2422_s0 + $0xf8] sm:$0xff]  }
  0x18   :  { %1705 = vmatprep.subr.bf16.mxu0 %v1860_v7  ;;  %1843 = vmatprep.subr.bf16.mxu1 %v1860_v7  ;;  %v1923_v5 = vld [vmem:[%s2422_s0 + $0x1e8] sm:$0xff]   ;;  %v1924_v6 = vld [vmem:[%s2422_s0 + $0x1f0] sm:$0xff]  }
  0x1b   :  { %1706 = vmatpush3.bf16.msra.mxu0 %v1860_v7  ;;  %1851 = vmatpush3.bf16.msra.mxu1 %v1860_v7  ;;  %v1925_v7 = vld [vmem:[%s2422_s0 + $0x1f8] sm:$0xff]  }
  0x1c   :  { %1707 = vmatprep.subr.bf16.mxu0 %v1861_v8  ;;  %1844 = vmatprep.subr.bf16.mxu1 %v1861_v8 }
  0x1f   :  { %1708 = vmatpush3.bf16.msra.mxu0 %v1861_v8  ;;  %1852 = vmatpush3.bf16.msra.mxu1 %v1861_v8 }
  0x22   :  { %1710 = vmatmul.mubr.bf16.vlgmr.msra.gmra.mxu0 %v1863_v9  ;;  %1774 = vmatmul.mubr.bf16.vlgmr.msra.gmra.mxu1 %v1895_v14 }
  0x23   :  { %1713 = vmatprep.mubr.bf16.mxu0 %v1864_v10  ;;  %1777 = vmatprep.mubr.bf16.mxu1 %v1896_v15 }
  0x2a   :  { %1714 = vmatmul.mubr.bf16.gmra.mxu0 %v1865_v11  ;;  %1778 = vmatmul.mubr.bf16.gmra.mxu1 %v1897_v18 }
  0x2b   :  { %1717 = vmatprep.mubr.bf16.mxu0 %v1866_v12  ;;  %1781 = vmatprep.mubr.bf16.mxu1 %v1898_v19 }
  0x32   :  { %1718 = vmatmul.mubr.bf16.gmra.mxu0 %v1867_v16  ;;  %1782 = vmatmul.mubr.bf16.gmra.mxu1 %v1899_v22 }
  0x33   :  { %1721 = vmatprep.mubr.bf16.mxu0 %v1868_v17  ;;  %1785 = vmatprep.mubr.bf16.mxu1 %v1900_v23 }
  0x3a   :  { %1722 = vmatmul.mubr.bf16.gmra.mxu0 %v1869_v20  ;;  %1786 = vmatmul.mubr.bf16.gmra.mxu1 %v1901_v26 }
  0x3b   :  { %1725 = vmatprep.mubr.bf16.mxu0 %v1870_v21  ;;  %1789 = vmatprep.mubr.bf16.mxu1 %v1902_v27 }
  0x42   :  { %1726 = vmatmul.mubr.bf16.gmra.mxu0 %v1871_v24  ;;  %1790 = vmatmul.mubr.bf16.gmra.mxu1 %v1903_v30 }
  0x43   :  { %1729 = vmatprep.mubr.bf16.mxu0 %v1872_v25  ;;  %1793 = vmatprep.mubr.bf16.mxu1 %v1904_v31 }
  0x4a   :  { %1730 = vmatmul.mubr.bf16.gmra.mxu0 %v1873_v28  ;;  %1794 = vmatmul.mubr.bf16.gmra.mxu1 %v1905_v34 }
  0x4b   :  { %1733 = vmatprep.mubr.bf16.mxu0 %v1874_v29  ;;  %1797 = vmatprep.mubr.bf16.mxu1 %v1906_v35 }
  0x52   :  { %1734 = vmatmul.mubr.bf16.gmra.mxu0 %v1875_v32  ;;  %1798 = vmatmul.mubr.bf16.gmra.mxu1 %v1907_v38 }
  0x53   :  { %1737 = vmatprep.mubr.bf16.mxu0 %v1876_v33  ;;  %1801 = vmatprep.mubr.bf16.mxu1 %v1908_v39 }
  0x5a   :  { %1738 = vmatmul.mubr.bf16.gmra.mxu0 %v1877_v36  ;;  %1802 = vmatmul.mubr.bf16.gmra.mxu1 %v1909_v42 }
  0x5b   :  { %1741 = vmatprep.mubr.bf16.mxu0 %v1878_v37  ;;  %1805 = vmatprep.mubr.bf16.mxu1 %v1910_v43 }
  0x62   :  { %1742 = vmatmul.mubr.bf16.gmra.mxu0 %v1879_v40  ;;  %1806 = vmatmul.mubr.bf16.gmra.mxu1 %v1911_v46 }
  0x63   :  { %1745 = vmatprep.mubr.bf16.mxu0 %v1880_v41  ;;  %1809 = vmatprep.mubr.bf16.mxu1 %v1912_v47 }
  0x6a   :  { %1746 = vmatmul.mubr.bf16.gmra.mxu0 %v1881_v44  ;;  %1810 = vmatmul.mubr.bf16.gmra.mxu1 %v1913_v50 }
  0x6b   :  { %1749 = vmatprep.mubr.bf16.mxu0 %v1882_v45  ;;  %1813 = vmatprep.mubr.bf16.mxu1 %v1914_v51 }
  0x72   :  { %1750 = vmatmul.mubr.bf16.gmra.mxu0 %v1883_v48  ;;  %1814 = vmatmul.mubr.bf16.gmra.mxu1 %v1915_v54 }
  0x73   :  { %1753 = vmatprep.mubr.bf16.mxu0 %v1884_v49  ;;  %1817 = vmatprep.mubr.bf16.mxu1 %v1916_v55 }
  0x7a   :  { %1754 = vmatmul.mubr.bf16.gmra.mxu0 %v1885_v52  ;;  %1818 = vmatmul.mubr.bf16.gmra.mxu1 %v1917_v58 }
  0x7b   :  { %1757 = vmatprep.mubr.bf16.mxu0 %v1886_v53  ;;  %1821 = vmatprep.mubr.bf16.mxu1 %v1918_v59 }
  0x82   :  { %1758 = vmatmul.mubr.bf16.gmra.mxu0 %v1887_v56  ;;  %1822 = vmatmul.mubr.bf16.gmra.mxu1 %v1919_v62 }
  0x83   :  { %1761 = vmatprep.mubr.bf16.mxu0 %v1888_v57  ;;  %1825 = vmatprep.mubr.bf16.mxu1 %v1920_v63 }
  0x8a   :  { %1762 = vmatmul.mubr.bf16.gmra.mxu0 %v1889_v60  ;;  %1826 = vmatmul.mubr.bf16.gmra.mxu1 %v1921_v2 }
  0x8b   :  { %1765 = vmatprep.mubr.bf16.mxu0 %v1890_v61  ;;  %1829 = vmatprep.mubr.bf16.mxu1 %v1922_v3 }
  0x92   :  { %1766 = vmatmul.mubr.bf16.gmra.mxu0 %v1891_v0  ;;  %1830 = vmatmul.mubr.bf16.gmra.mxu1 %v1923_v5 }
  0x93   :  { %1769 = vmatprep.mubr.bf16.mxu0 %v1892_v1  ;;  %1833 = vmatprep.mubr.bf16.mxu1 %v1924_v6 }
  0x9a   :  { %1770 = vmatmul.mubr.bf16.gmra.mxu0 %v1893_v4  ;;  %1834 = vmatmul.mubr.bf16.gmra.mxu1 %v1925_v7 }
  0xe2   :  { %v1711_v8 = vpop.f32.mrf.mxu0  ;;  %v2163_v19 = vpop.f32.mrf.mxu1 }
  0xe3   :  { %v1280_v16 = vmul.f32 %v1711_v8, %v1711_v8 }
  0xe4   :  { %v630_v9 = vpop.f32.mrf.mxu0  ;;  %v2165_v24 = vpop.f32.mrf.mxu1 }
  0xe5   :  { %v1278_v12 = vmul.f32 %v630_v9, %v630_v9 }
  0xe6   :  { %v1712_v10 = vpop.f32.mrf.mxu0  ;;  %v2167_v29 = vpop.f32.mrf.mxu1 }
  0xe7   :  { %v1281_v21 = vmul.f32 %v1712_v10, %v1712_v10 }
  0xe8   :  { %v633_v11 = vpop.f32.mrf.mxu0  ;;  %v2169_v34 = vpop.f32.mrf.mxu1 }
  0xe9   :  { %v1142_v13 = vadd.f32 %v633_v11, %v630_v9  ;;  %v1279_v14 = vmul.f32 %v633_v11, %v633_v11 }
  0xea   :  { %v1715_v15 = vpop.f32.mrf.mxu0  ;;  %v2171_v39 = vpop.f32.mrf.mxu1 }
  0xeb   :  { %v1143_v17 = vadd.f32 %v1711_v8, %v1142_v13  ;;  %v1406_v18 = vadd.f32 %v1279_v14, %v1278_v12  ;;  %v1284_v36 = vmul.f32 %v1715_v15, %v1715_v15 }
  0xec   :  { %v646_v20 = vpop.f32.mrf.mxu0  ;;  %v2173_v45 = vpop.f32.mrf.mxu1 }
  0xed   :  { %v1407_v22 = vadd.f32 %v1406_v18, %v1280_v16  ;;  %v1144_v23 = vadd.f32 %v1712_v10, %v1143_v17  ;;  %v1282_v27 = vmul.f32 %v646_v20, %v646_v20 }
  0xee   :  { %v1716_v25 = vpop.f32.mrf.mxu0  ;;  %v2175_v54 = vpop.f32.mrf.mxu1 }
  0xef   :  { %v1145_v26 = vadd.f32 %v1144_v23, %v646_v20  ;;  %v1408_v28 = vadd.f32 %v1407_v22, %v1281_v21  ;;  %v1285_v41 = vmul.f32 %v1716_v25, %v1716_v25 }
  0xf0   :  { %v649_v30 = vpop.f32.mrf.mxu0  ;;  %v2177_v63 = vpop.f32.mrf.mxu1 }
  0xf1   :  { %v1409_v31 = vadd.f32 %v1408_v28, %v1282_v27  ;;  %v1146_v32 = vadd.f32 %v1145_v26, %v649_v30  ;;  %v1283_v33 = vmul.f32 %v649_v30, %v649_v30 }
  0xf2   :  { %v1719_v35 = vpop.f32.mrf.mxu0  ;;  %v2179_v8 = vpop.f32.mrf.mxu1 }
  0xf3   :  { %v1147_v37 = vadd.f32 %v1715_v15, %v1146_v32  ;;  %v1410_v38 = vadd.f32 %v1409_v31, %v1283_v33  ;;  %v1288_v55 = vmul.f32 %v1719_v35, %v1719_v35 }
  0xf4   :  { %v662_v40 = vpop.f32.mrf.mxu0  ;;  %v2181_v17 = vpop.f32.mrf.mxu1 }
  0xf5   :  { %v1411_v42 = vadd.f32 %v1410_v38, %v1284_v36  ;;  %v1148_v43 = vadd.f32 %v1716_v25, %v1147_v37  ;;  %v1286_v47 = vmul.f32 %v662_v40, %v662_v40 }
  0xf6   :  { %v1720_v44 = vpop.f32.mrf.mxu0  ;;  %v2183_v28 = vpop.f32.mrf.mxu1 }
  0xf7   :  { %v1149_v46 = vadd.f32 %v1148_v43, %v662_v40  ;;  %v1412_v48 = vadd.f32 %v1411_v42, %v1285_v41  ;;  %v1289_v59 = vmul.f32 %v1720_v44, %v1720_v44 }
  0xf8   :  { %v665_v49 = vpop.f32.mrf.mxu0  ;;  %v2185_v40 = vpop.f32.mrf.mxu1 }
  0xf9   :  { %v1413_v50 = vadd.f32 %v1412_v48, %v1286_v47  ;;  %v1150_v51 = vadd.f32 %v1149_v46, %v665_v49  ;;  %v1287_v52 = vmul.f32 %v665_v49, %v665_v49 }
  0xfa   :  { %v1723_v53 = vpop.f32.mrf.mxu0 }
  0xfb   :  { %v1151_v56 = vadd.f32 %v1719_v35, %v1150_v51  ;;  %v1414_v57 = vadd.f32 %v1413_v50, %v1287_v52  ;;  %v1292_v9 = vmul.f32 %v1723_v53, %v1723_v53  ;;  %v2187_v50 = vpop.f32.mrf.mxu1 }
  0xfc   :  { %v678_v58 = vpop.f32.mrf.mxu0 }
  0xfd   :  { %v1415_v60 = vadd.f32 %v1414_v57, %v1288_v55  ;;  %v1152_v61 = vadd.f32 %v1720_v44, %v1151_v56  ;;  %v1290_v1 = vmul.f32 %v678_v58, %v678_v58 }
  0xfe   :  { %v1724_v62 = vpop.f32.mrf.mxu0 }
  0xff   :  { %v1153_v0 = vadd.f32 %v1152_v61, %v678_v58  ;;  %v1416_v2 = vadd.f32 %v1415_v60, %v1289_v59  ;;  %v1293_v13 = vmul.f32 %v1724_v62, %v1724_v62  ;;  %v2189_v60 = vpop.f32.mrf.mxu1 }
 0x100   :  { %v681_v3 = vpop.f32.mrf.mxu0 }
 0x101   :  { %v1417_v4 = vadd.f32 %v1416_v2, %v1290_v1  ;;  %v1154_v5 = vadd.f32 %v1153_v0, %v681_v3  ;;  %v1291_v6 = vmul.f32 %v681_v3, %v681_v3 }
 0x102   :  { %v1727_v7 = vpop.f32.mrf.mxu0 }
 0x103   :  { %v1155_v10 = vadd.f32 %v1723_v53, %v1154_v5  ;;  %v1418_v11 = vadd.f32 %v1417_v4, %v1291_v6  ;;  %v1296_v30 = vmul.f32 %v1727_v7, %v1727_v7  ;;  %v2191_v6 = vpop.f32.mrf.mxu1 }
 0x104   :  { %v694_v12 = vpop.f32.mrf.mxu0 }
 0x105   :  { %v1419_v14 = vadd.f32 %v1418_v11, %v1292_v9  ;;  %v1156_v15 = vadd.f32 %v1724_v62, %v1155_v10  ;;  %v1294_v20 = vmul.f32 %v694_v12, %v694_v12 }
 0x106   :  { %v1728_v16 = vpop.f32.mrf.mxu0 }
 0x107   :  { %v1157_v18 = vadd.f32 %v1156_v15, %v694_v12  ;;  %v1420_v21 = vadd.f32 %v1419_v14, %v1293_v13  ;;  %v1297_v35 = vmul.f32 %v1728_v16, %v1728_v16 }
 0x108   :  { %v697_v22 = vpop.f32.mrf.mxu0 }
 0x109   :  { %v1421_v23 = vadd.f32 %v1420_v21, %v1294_v20  ;;  %v1158_v25 = vadd.f32 %v1157_v18, %v697_v22  ;;  %v1295_v26 = vmul.f32 %v697_v22, %v697_v22 }
 0x10a   :  { %v1731_v27 = vpop.f32.mrf.mxu0 }
 0x10b   :  { %v1159_v31 = vadd.f32 %v1727_v7, %v1158_v25  ;;  %v1422_v32 = vadd.f32 %v1421_v23, %v1295_v26  ;;  %v1300_v51 = vmul.f32 %v1731_v27, %v1731_v27 }
 0x10c   :  { %v710_v33 = vpop.f32.mrf.mxu0 }
 0x10d   :  { %v1423_v36 = vadd.f32 %v1422_v32, %v1296_v30  ;;  %v1160_v37 = vadd.f32 %v1728_v16, %v1159_v31  ;;  %v1298_v42 = vmul.f32 %v710_v33, %v710_v33  ;;  %v2193_v16 = vpop.f32.mrf.mxu1 }
 0x10e   :  { %v1732_v38 = vpop.f32.mrf.mxu0 }
 0x10f   :  { %v1161_v41 = vadd.f32 %v1160_v37, %v710_v33  ;;  %v1424_v43 = vadd.f32 %v1423_v36, %v1297_v35  ;;  %v1301_v56 = vmul.f32 %v1732_v38, %v1732_v38  ;;  %v2195_v30 = vpop.f32.mrf.mxu1 }
 0x110   :  { %v713_v44 = vpop.f32.mrf.mxu0 }
 0x111   :  { %v1425_v46 = vadd.f32 %v1424_v43, %v1298_v42  ;;  %v1162_v47 = vadd.f32 %v1161_v41, %v713_v44  ;;  %v1299_v48 = vmul.f32 %v713_v44, %v713_v44  ;;  %v2197_v42 = vpop.f32.mrf.mxu1 }
 0x112   :  { %v1735_v49 = vpop.f32.mrf.mxu0 }
 0x113   :  { %v1163_v52 = vadd.f32 %v1731_v27, %v1162_v47  ;;  %v1426_v53 = vadd.f32 %v1425_v46, %v1299_v48  ;;  %v1304_v7 = vmul.f32 %v1735_v49, %v1735_v49 }
 0x114   :  { %v726_v55 = vpop.f32.mrf.mxu0 }
 0x115   :  { %v1427_v57 = vadd.f32 %v1426_v53, %v1300_v51  ;;  %v1164_v58 = vadd.f32 %v1732_v38, %v1163_v52  ;;  %v1302_v62 = vmul.f32 %v726_v55, %v726_v55  ;;  %v2199_v53 = vpop.f32.mrf.mxu1 }
 0x116   :  { %v1736_v59 = vpop.f32.mrf.mxu0 }
 0x117   :  { %v1165_v61 = vadd.f32 %v1164_v58, %v726_v55  ;;  %v1428_v0 = vadd.f32 %v1427_v57, %v1301_v56  ;;  %v1305_v12 = vmul.f32 %v1736_v59, %v1736_v59 }
 0x118   :  { %v729_v1 = vpop.f32.mrf.mxu0 }
 0x119   :  { %v1429_v2 = vadd.f32 %v1428_v0, %v1302_v62  ;;  %v1166_v3 = vadd.f32 %v1165_v61, %v729_v1  ;;  %v1303_v4 = vmul.f32 %v729_v1, %v729_v1  ;;  %v2201_v1 = vpop.f32.mrf.mxu1 }
 0x11a   :  { %v1739_v5 = vpop.f32.mrf.mxu0 }
 0x11b   :  { %v1167_v9 = vadd.f32 %v1735_v49, %v1166_v3  ;;  %v1430_v10 = vadd.f32 %v1429_v2, %v1303_v4  ;;  %v1308_v31 = vmul.f32 %v1739_v5, %v1739_v5 }
 0x11c   :  { %v742_v11 = vpop.f32.mrf.mxu0 }
 0x11d   :  { %v1431_v13 = vadd.f32 %v1430_v10, %v1304_v7  ;;  %v1168_v14 = vadd.f32 %v1736_v59, %v1167_v9  ;;  %v1306_v20 = vmul.f32 %v742_v11, %v742_v11 }
 0x11e   :  { %v1740_v15 = vpop.f32.mrf.mxu0 }
 0x11f   :  { %v1169_v18 = vadd.f32 %v1168_v14, %v742_v11  ;;  %v1432_v21 = vadd.f32 %v1431_v13, %v1305_v12  ;;  %v1309_v36 = vmul.f32 %v1740_v15, %v1740_v15  ;;  %v2203_v12 = vpop.f32.mrf.mxu1 }
 0x120   :  { %v745_v22 = vpop.f32.mrf.mxu0 }
 0x121   :  { %v1433_v23 = vadd.f32 %v1432_v21, %v1306_v20  ;;  %v1170_v25 = vadd.f32 %v1169_v18, %v745_v22  ;;  %v1307_v26 = vmul.f32 %v745_v22, %v745_v22 }
 0x122   :  { %v1743_v27 = vpop.f32.mrf.mxu0 }
 0x123   :  { %v1171_v32 = vadd.f32 %v1739_v5, %v1170_v25  ;;  %v1434_v33 = vadd.f32 %v1433_v23, %v1307_v26  ;;  %v1312_v55 = vmul.f32 %v1743_v27, %v1743_v27  ;;  %v2205_v25 = vpop.f32.mrf.mxu1 }
 0x124   :  { %v758_v35 = vpop.f32.mrf.mxu0 }
 0x125   :  { %v1435_v37 = vadd.f32 %v1434_v33, %v1308_v31  ;;  %v1172_v38 = vadd.f32 %v1740_v15, %v1171_v32  ;;  %v1310_v44 = vmul.f32 %v758_v35, %v758_v35 }
 0x126   :  { %v1744_v41 = vpop.f32.mrf.mxu0 }
 0x127   :  { %v1173_v43 = vadd.f32 %v1172_v38, %v758_v35  ;;  %v1436_v46 = vadd.f32 %v1435_v37, %v1309_v36  ;;  %v1313_v59 = vmul.f32 %v1744_v41, %v1744_v41  ;;  %v2207_v38 = vpop.f32.mrf.mxu1 }
 0x128   :  { %v761_v47 = vpop.f32.mrf.mxu0 }
 0x129   :  { %v1437_v48 = vadd.f32 %v1436_v46, %v1310_v44  ;;  %v1174_v49 = vadd.f32 %v1173_v43, %v761_v47  ;;  %v1311_v51 = vmul.f32 %v761_v47, %v761_v47 }
 0x12a   :  { %v1747_v52 = vpop.f32.mrf.mxu0 }
 0x12b   :  { %v1175_v56 = vadd.f32 %v1743_v27, %v1174_v49  ;;  %v1438_v57 = vadd.f32 %v1437_v48, %v1311_v51  ;;  %v1316_v13 = vmul.f32 %v1747_v52, %v1747_v52 }
 0x12c   :  { %v774_v58 = vpop.f32.mrf.mxu0 }
 0x12d   :  { %v1439_v61 = vadd.f32 %v1438_v57, %v1312_v55  ;;  %v1176_v62 = vadd.f32 %v1744_v41, %v1175_v56  ;;  %v1314_v3 = vmul.f32 %v774_v58, %v774_v58 }
 0x12e   :  { %v1748_v0 = vpop.f32.mrf.mxu0 }
 0x12f   :  { %v1177_v2 = vadd.f32 %v1176_v62, %v774_v58  ;;  %v1440_v4 = vadd.f32 %v1439_v61, %v1313_v59  ;;  %v1317_v20 = vmul.f32 %v1748_v0, %v1748_v0 }
 0x130   :  { %v777_v5 = vpop.f32.mrf.mxu0 }
 0x131   :  { %v1441_v7 = vadd.f32 %v1440_v4, %v1314_v3  ;;  %v1178_v9 = vadd.f32 %v1177_v2, %v777_v5  ;;  %v1315_v10 = vmul.f32 %v777_v5, %v777_v5 }
 0x132   :  { %v1751_v11 = vpop.f32.mrf.mxu0 }
 0x133   :  { %v1179_v14 = vadd.f32 %v1747_v52, %v1178_v9  ;;  %v1442_v15 = vadd.f32 %v1441_v7, %v1315_v10  ;;  %v1320_v41 = vmul.f32 %v1751_v11, %v1751_v11  ;;  %v2209_v52 = vpop.f32.mrf.mxu1 }
 0x134   :  { %v790_v18 = vpop.f32.mrf.mxu0 }
 0x135   :  { %v1443_v21 = vadd.f32 %v1442_v15, %v1316_v13  ;;  %v1180_v22 = vadd.f32 %v1748_v0, %v1179_v14  ;;  %v1318_v27 = vmul.f32 %v790_v18, %v790_v18  ;;  %v2211_v2 = vpop.f32.mrf.mxu1 }
 0x136   :  { %v1752_v23 = vpop.f32.mrf.mxu0 }
 0x137   :  { %v1181_v26 = vadd.f32 %v1180_v22, %v790_v18  ;;  %v1444_v31 = vadd.f32 %v1443_v21, %v1317_v20  ;;  %v1321_v47 = vmul.f32 %v1752_v23, %v1752_v23  ;;  %v2213_v14 = vpop.f32.mrf.mxu1 }
 0x138   :  { %v793_v32 = vpop.f32.mrf.mxu0 }
 0x139   :  { %v1445_v33 = vadd.f32 %v1444_v31, %v1318_v27  ;;  %v1182_v35 = vadd.f32 %v1181_v26, %v793_v32  ;;  %v1319_v36 = vmul.f32 %v793_v32, %v793_v32  ;;  %v2215_v31 = vpop.f32.mrf.mxu1 }
 0x13a   :  { %v1755_v37 = vpop.f32.mrf.mxu0 }
 0x13b   :  { %v1183_v43 = vadd.f32 %v1751_v11, %v1182_v35  ;;  %v1446_v44 = vadd.f32 %v1445_v33, %v1319_v36  ;;  %v1324_v3 = vmul.f32 %v1755_v37, %v1755_v37 }
 0x13c   :  { %v806_v46 = vpop.f32.mrf.mxu0 }
 0x13d   :  { %v1447_v48 = vadd.f32 %v1446_v44, %v1320_v41  ;;  %v1184_v49 = vadd.f32 %v1752_v23, %v1183_v43  ;;  %v1322_v56 = vmul.f32 %v806_v46, %v806_v46 }
 0x13e   :  { %v1756_v51 = vpop.f32.mrf.mxu0 }
 0x13f   :  { %v1185_v55 = vadd.f32 %v1184_v49, %v806_v46  ;;  %v1448_v57 = vadd.f32 %v1447_v48, %v1321_v47  ;;  %v1325_v9 = vmul.f32 %v1756_v51, %v1756_v51  ;;  %v2217_v46 = vpop.f32.mrf.mxu1 }
 0x140   :  { %v809_v58 = vpop.f32.mrf.mxu0 }
 0x141   :  { %v1449_v59 = vadd.f32 %v1448_v57, %v1322_v56  ;;  %v1186_v61 = vadd.f32 %v1185_v55, %v809_v58  ;;  %v1323_v62 = vmul.f32 %v809_v58, %v809_v58 }
 0x142   :  { %v1759_v0 = vpop.f32.mrf.mxu0 }
 0x143   :  { %v1187_v4 = vadd.f32 %v1755_v37, %v1186_v61  ;;  %v1450_v5 = vadd.f32 %v1449_v59, %v1323_v62  ;;  %v1328_v32 = vmul.f32 %v1759_v0, %v1759_v0  ;;  %v2219_v59 = vpop.f32.mrf.mxu1 }
 0x144   :  { %v822_v7 = vpop.f32.mrf.mxu0 }
 0x145   :  { %v1451_v10 = vadd.f32 %v1450_v5, %v1324_v3  ;;  %v1188_v11 = vadd.f32 %v1756_v51, %v1187_v4  ;;  %v1326_v18 = vmul.f32 %v822_v7, %v822_v7 }
 0x146   :  { %v1760_v13 = vpop.f32.mrf.mxu0 }
 0x147   :  { %v1189_v15 = vadd.f32 %v1188_v11, %v822_v7  ;;  %v1452_v20 = vadd.f32 %v1451_v10, %v1325_v9  ;;  %v1329_v37 = vmul.f32 %v1760_v13, %v1760_v13  ;;  %v2221_v10 = vpop.f32.mrf.mxu1 }
 0x148   :  { %v825_v21 = vpop.f32.mrf.mxu0 }
 0x149   :  { %v1453_v22 = vadd.f32 %v1452_v20, %v1326_v18  ;;  %v1190_v23 = vadd.f32 %v1189_v15, %v825_v21  ;;  %v1327_v26 = vmul.f32 %v825_v21, %v825_v21 }
 0x14a   :  { %v1763_v27 = vpop.f32.mrf.mxu0 }
 0x14b   :  { %v1191_v33 = vadd.f32 %v1759_v0, %v1190_v23  ;;  %v1454_v35 = vadd.f32 %v1453_v22, %v1327_v26  ;;  %v1332_v61 = vmul.f32 %v1763_v27, %v1763_v27  ;;  %v2223_v26 = vpop.f32.mrf.mxu1 }
 0x14c   :  { %v838_v36 = vpop.f32.mrf.mxu0 }
 0x14d   :  { %v1455_v41 = vadd.f32 %v1454_v35, %v1328_v32  ;;  %v1192_v43 = vadd.f32 %v1760_v13, %v1191_v33  ;;  %v1330_v48 = vmul.f32 %v838_v36, %v838_v36 }
 0x14e   :  { %v1764_v44 = vpop.f32.mrf.mxu0 }
 0x14f   :  { %v1193_v47 = vadd.f32 %v1192_v43, %v838_v36  ;;  %v1456_v49 = vadd.f32 %v1455_v41, %v1329_v37  ;;  %v1333_v4 = vmul.f32 %v1764_v44, %v1764_v44 }
 0x150   :  { %v841_v51 = vpop.f32.mrf.mxu0 }
 0x151   :  { %v1457_v55 = vadd.f32 %v1456_v49, %v1330_v48  ;;  %v1194_v56 = vadd.f32 %v1193_v47, %v841_v51  ;;  %v1331_v57 = vmul.f32 %v841_v51, %v841_v51 }
 0x152   :  { %v1767_v58 = vpop.f32.mrf.mxu0 }
 0x153   :  { %v1195_v62 = vadd.f32 %v1763_v27, %v1194_v56  ;;  %v1458_v0 = vadd.f32 %v1457_v55, %v1331_v57  ;;  %v1336_v32 = vmul.f32 %v1767_v58, %v1767_v58 }
 0x154   :  { %v854_v3 = vpop.f32.mrf.mxu0 }
 0x155   :  { %v1459_v5 = vadd.f32 %v1458_v0, %v1332_v61  ;;  %v1196_v7 = vadd.f32 %v1764_v44, %v1195_v62  ;;  %v1334_v13 = vmul.f32 %v854_v3, %v854_v3  ;;  %v2225_v44 = vpop.f32.mrf.mxu1  ;;  %v1926_v62 = vmov 0.0  }
 0x156   :  { %v1768_v9 = vpop.f32.mrf.mxu0  ;;  %18 = vst [vmem:[%s2423_s2] sm:$0x1] %v1926_v62  ;;  %19 = vst [vmem:[%s2424_s3] sm:$0x1] %v1926_v62 }
 0x157   :  { %v1197_v11 = vadd.f32 %v1196_v7, %v854_v3  ;;  %v1460_v15 = vadd.f32 %v1459_v5, %v1333_v4  ;;  %v1337_v36 = vmul.f32 %v1768_v9, %v1768_v9  ;;  %v2227_v61 = vpop.f32.mrf.mxu1 }
 0x158   :  { %v857_v18 = vpop.f32.mrf.mxu0 }
 0x159   :  { %v1461_v20 = vadd.f32 %v1460_v15, %v1334_v13  ;;  %v1198_v21 = vadd.f32 %v1197_v11, %v857_v18  ;;  %v1335_v22 = vmul.f32 %v857_v18, %v857_v18  ;;  %v1342_v11 = vmul.f32 %v2165_v24, %v2165_v24 }
 0x15a   :  { %v1771_v23 = vpop.f32.mrf.mxu0 }
 0x15b   :  { %v1199_v27 = vadd.f32 %v1767_v58, %v1198_v21  ;;  %v1462_v33 = vadd.f32 %v1461_v20, %v1335_v22  ;;  %v1340_v58 = vmul.f32 %v1771_v23, %v1771_v23  ;;  %v1343_v21 = vmul.f32 %v2169_v34, %v2169_v34 }
 0x15c   :  { %v870_v35 = vpop.f32.mrf.mxu0 }
 0x15d   :  { %v1463_v37 = vadd.f32 %v1462_v33, %v1336_v32  ;;  %v1200_v41 = vadd.f32 %v1768_v9, %v1199_v27  ;;  %v1338_v48 = vmul.f32 %v870_v35, %v870_v35  ;;  %v2235_v9 = vpop.f32.mrf.mxu1  ;;  %v1345_v33 = vmul.f32 %v2167_v29, %v2167_v29 }
 0x15e   :  { %v1772_v43 = vpop.f32.mrf.mxu0 }
 0x15f   :  { %v1201_v47 = vadd.f32 %v1200_v41, %v870_v35  ;;  %v1464_v49 = vadd.f32 %v1463_v37, %v1337_v36  ;;  %v1341_v4 = vmul.f32 %v1772_v43, %v1772_v43  ;;  %v2243_v22 = vpop.f32.mrf.mxu1 }
 0x160   :  { %v873_v51 = vpop.f32.mrf.mxu0 }
 0x161   :  { %v1465_v55 = vadd.f32 %v1464_v49, %v1338_v48  ;;  %v1202_v56 = vadd.f32 %v1201_v47, %v873_v51  ;;  %v1339_v57 = vmul.f32 %v873_v51, %v873_v51  ;;  %v2251_v36 = vpop.f32.mrf.mxu1  ;;  %v1348_v49 = vmul.f32 %v2171_v39, %v2171_v39 }
 0x163   :  { %v1203_v0 = vadd.f32 %v1771_v23, %v1202_v56  ;;  %v1466_v3 = vadd.f32 %v1465_v55, %v1339_v57  ;;  %v1344_v23 = vmul.f32 %v2163_v19, %v2163_v19  ;;  %v2259_v48 = vpop.f32.mrf.mxu1  ;;  %v1349_v55 = vmul.f32 %v2175_v54, %v2175_v54 }
 0x165   :  { %v1204_v5 = vadd.f32 %v1772_v43, %v1203_v0  ;;  %v1467_v7 = vadd.f32 %v1466_v3, %v1340_v58  ;;  %v2267_v57 = vpop.f32.mrf.mxu1 }
 0x167   :  { %v1205_v13 = vadd.f32 %v1204_v5, %v2165_v24  ;;  %v1468_v15 = vadd.f32 %v1467_v7, %v1341_v4  ;;  %v2275_v4 = vpop.f32.mrf.mxu1  ;;  %v1352_v5 = vmul.f32 %v2179_v8, %v2179_v8 }
 0x169   :  { %v1469_v18 = vadd.f32 %v1468_v15, %v1342_v11  ;;  %v1206_v20 = vadd.f32 %v1205_v13, %v2169_v34  ;;  %v1346_v34 = vmul.f32 %v2173_v45, %v2173_v45  ;;  %v1353_v11 = vmul.f32 %v2183_v28, %v2183_v28  ;;  %v2283_v15 = vpop.f32.mrf.mxu1 }
 0x16b   :  { %v1207_v32 = vadd.f32 %v2163_v19, %v1206_v20  ;;  %v1470_v27 = vadd.f32 %v1469_v18, %v1343_v21  ;;  %v1347_v19 = vmul.f32 %v2177_v63, %v2177_v63 }
 0x16d   :  { %v1471_v35 = vadd.f32 %v1470_v27, %v1344_v23  ;;  %v1208_v24 = vadd.f32 %v2167_v29, %v1207_v32  ;;  %v2291_v32 = vpop.f32.mrf.mxu1  ;;  %v1356_v27 = vmul.f32 %v2187_v50, %v2187_v50 }
 0x16f   :  { %v1209_v37 = vadd.f32 %v1208_v24, %v2173_v45  ;;  %v1472_v41 = vadd.f32 %v1471_v35, %v1345_v33  ;;  %v1357_v35 = vmul.f32 %v2191_v6, %v2191_v6 }
 0x171   :  { %v1473_v43 = vadd.f32 %v1472_v41, %v1346_v34  ;;  %v1210_v47 = vadd.f32 %v1209_v37, %v2177_v63  ;;  %v1350_v63 = vmul.f32 %v2181_v17, %v2181_v17  ;;  %v2299_v37 = vpop.f32.mrf.mxu1 }
 0x173   :  { %v1211_v29 = vadd.f32 %v2171_v39, %v1210_v47  ;;  %v1474_v51 = vadd.f32 %v1473_v43, %v1347_v19  ;;  %v1351_v39 = vmul.f32 %v2185_v40, %v2185_v40  ;;  %v2307_v19 = vpop.f32.mrf.mxu1 }
 0x175   :  { %v1475_v56 = vadd.f32 %v1474_v51, %v1348_v49  ;;  %v1212_v45 = vadd.f32 %v2175_v54, %v1211_v29  ;;  %v1360_v49 = vmul.f32 %v2195_v30, %v2195_v30  ;;  %v1361_v51 = vmul.f32 %v2199_v53, %v2199_v53 }
 0x177   :  { %v1213_v62 = vadd.f32 %v1212_v45, %v2181_v17  ;;  %v1476_v58 = vadd.f32 %v1475_v56, %v1349_v55  ;;  %v2315_v56 = vpop.f32.mrf.mxu1 }
 0x179   :  { %v1477_v0 = vadd.f32 %v1476_v58, %v1350_v63  ;;  %v1214_v3 = vadd.f32 %v1213_v62, %v2185_v40  ;;  %v1354_v40 = vmul.f32 %v2189_v60, %v2189_v60 }
 0x17b   :  { %v1215_v54 = vadd.f32 %v2179_v8, %v1214_v3  ;;  %v1478_v7 = vadd.f32 %v1477_v0, %v1351_v39  ;;  %v1355_v8 = vmul.f32 %v2193_v16, %v2193_v16  ;;  %v2323_v0 = vpop.f32.mrf.mxu1  ;;  %v1364_v3 = vmul.f32 %v2203_v12, %v2203_v12 }
 0x17d   :  { %v1479_v13 = vadd.f32 %v1478_v7, %v1352_v5  ;;  %v1216_v17 = vadd.f32 %v2183_v28, %v1215_v54  ;;  %v1365_v5 = vmul.f32 %v2207_v38, %v2207_v38  ;;  %v2331_v7 = vpop.f32.mrf.mxu1 }
 0x17f   :  { %v1217_v18 = vadd.f32 %v1216_v17, %v2189_v60  ;;  %v1480_v20 = vadd.f32 %v1479_v13, %v1353_v11 }
 0x181   :  { %v1481_v21 = vadd.f32 %v1480_v20, %v1354_v40  ;;  %v1218_v23 = vadd.f32 %v1217_v18, %v2193_v16  ;;  %v1358_v16 = vmul.f32 %v2197_v42, %v2197_v42  ;;  %v2339_v40 = vpop.f32.mrf.mxu1  ;;  %v1368_v20 = vmul.f32 %v2211_v2, %v2211_v2 }
 0x183   :  { %v1219_v28 = vadd.f32 %v2187_v50, %v1218_v23  ;;  %v1482_v33 = vadd.f32 %v1481_v21, %v1355_v8  ;;  %v1359_v50 = vmul.f32 %v2201_v1, %v2201_v1  ;;  %v1369_v23 = vmul.f32 %v2215_v31, %v2215_v31 }
 0x185   :  { %v1483_v24 = vadd.f32 %v1482_v33, %v1356_v27  ;;  %v1220_v60 = vadd.f32 %v2191_v6, %v1219_v28  ;;  %v1065_v27 = vpop.f32.mrf.mxu1 }
 0x187   :  { %v1221_v34 = vadd.f32 %v1220_v60, %v2197_v42  ;;  %v1484_v41 = vadd.f32 %v1483_v24, %v1357_v35  ;;  %v2353_v60 = vpop.f32.mrf.mxu1 }
 0x189   :  { %v1485_v43 = vadd.f32 %v1484_v41, %v1358_v16  ;;  %v1222_v47 = vadd.f32 %v1221_v34, %v2201_v1  ;;  %v1362_v1 = vmul.f32 %v2205_v25, %v2205_v25  ;;  %v1372_v34 = vmul.f32 %v2219_v59, %v2219_v59 }
 0x18a   :  { %v1373_v41 = vmul.f32 %v2223_v26, %v2223_v26 }
 0x18b   :  { %v1223_v6 = vadd.f32 %v2195_v30, %v1222_v47  ;;  %v1486_v29 = vadd.f32 %v1485_v43, %v1359_v50  ;;  %v1363_v30 = vmul.f32 %v2209_v52, %v2209_v52  ;;  %v1078_v47 = vpop.f32.mrf.mxu1 }
 0x18d   :  { %v1487_v55 = vadd.f32 %v1486_v29, %v1360_v49  ;;  %v1224_v42 = vadd.f32 %v2199_v53, %v1223_v6 }
 0x18f   :  { %v1225_v45 = vadd.f32 %v1224_v42, %v2205_v25  ;;  %v1488_v62 = vadd.f32 %v1487_v55, %v1361_v51  ;;  %v1824_v51 = vpop.f32.mrf.mxu1  ;;  %v1376_v55 = vmul.f32 %v2227_v61, %v2227_v61 }
 0x191   :  { %v1489_v63 = vadd.f32 %v1488_v62, %v1362_v1  ;;  %v1226_v58 = vadd.f32 %v1225_v45, %v2209_v52  ;;  %v1366_v52 = vmul.f32 %v2213_v14, %v2213_v14  ;;  %v1377_v45 = vmul.f32 %v2243_v22, %v2243_v22  ;;  %v1081_v62 = vpop.f32.mrf.mxu1 }
 0x193   :  { %v1227_v53 = vadd.f32 %v2203_v12, %v1226_v58  ;;  %v1490_v39 = vadd.f32 %v1489_v63, %v1363_v30  ;;  %v1367_v12 = vmul.f32 %v2217_v46, %v2217_v46  ;;  %v1378_v58 = vmul.f32 %v2267_v57, %v2267_v57 }
 0x195   :  { %v1491_v54 = vadd.f32 %v1490_v39, %v1364_v3  ;;  %v1228_v25 = vadd.f32 %v2207_v38, %v1227_v53  ;;  %v1827_v53 = vpop.f32.mrf.mxu1  ;;  %v1380_v39 = vmul.f32 %v2259_v48, %v2259_v48 }
 0x197   :  { %v1229_v11 = vadd.f32 %v1228_v25, %v2213_v14  ;;  %v1492_v13 = vadd.f32 %v1491_v54, %v1365_v5  ;;  %v1381_v54 = vmul.f32 %v2275_v4, %v2275_v4 }
 0x199   :  { %v1493_v17 = vadd.f32 %v1492_v13, %v1366_v52  ;;  %v1230_v18 = vadd.f32 %v1229_v11, %v2217_v46  ;;  %v1370_v46 = vmul.f32 %v2221_v10, %v2221_v10  ;;  %v1094_v11 = vpop.f32.mrf.mxu1  ;;  %v1382_v13 = vmul.f32 %v2299_v37, %v2299_v37 }
 0x19b   :  { %v1231_v38 = vadd.f32 %v2211_v2, %v1230_v18  ;;  %v1494_v21 = vadd.f32 %v1493_v17, %v1367_v12  ;;  %v1371_v2 = vmul.f32 %v2225_v44, %v2225_v44  ;;  %v1828_v12 = vpop.f32.mrf.mxu1 }
 0x19d   :  { %v1495_v8 = vadd.f32 %v1494_v21, %v1368_v20  ;;  %v1232_v14 = vadd.f32 %v2215_v31, %v1231_v38  ;;  %v1384_v20 = vmul.f32 %v2291_v32, %v2291_v32  ;;  %v1385_v21 = vmul.f32 %v2307_v19, %v2307_v19 }
 0x19f   :  { %v1233_v28 = vadd.f32 %v1232_v14, %v2221_v10  ;;  %v1496_v33 = vadd.f32 %v1495_v8, %v1369_v23  ;;  %v1097_v8 = vpop.f32.mrf.mxu1 }
 0x1a1   :  { %v1497_v35 = vadd.f32 %v1496_v33, %v1370_v46  ;;  %v1234_v24 = vadd.f32 %v1233_v28, %v2225_v44  ;;  %v1374_v44 = vmul.f32 %v2235_v9, %v2235_v9  ;;  %v1386_v28 = vmul.f32 %v2331_v7, %v2331_v7 }
 0x1a3   :  { %v1235_v31 = vadd.f32 %v2219_v59, %v1234_v24  ;;  %v1498_v16 = vadd.f32 %v1497_v35, %v1371_v2  ;;  %v1375_v59 = vmul.f32 %v2251_v36, %v2251_v36  ;;  %v1387_v35 = vmul.f32 %v1065_v27, %v1065_v27  ;;  %v1831_v24 = vpop.f32.mrf.mxu1 }
 0x1a5   :  { %v1499_v43 = vadd.f32 %v1498_v16, %v1372_v34  ;;  %v1236_v10 = vadd.f32 %v2223_v26, %v1235_v31 }
 0x1a7   :  { %v1237_v50 = vadd.f32 %v1236_v10, %v2235_v9  ;;  %v1500_v49 = vadd.f32 %v1499_v43, %v1373_v41  ;;  %v1110_v41 = vpop.f32.mrf.mxu1 }
 0x1a9   :  { %v1501_v6 = vadd.f32 %v1500_v49, %v1374_v44  ;;  %v1238_v29 = vadd.f32 %v1237_v50, %v2251_v36  ;;  %v1832_v49 = vpop.f32.mrf.mxu1 }
 0x1ab   :  { %v1239_v42 = vadd.f32 %v2227_v61, %v1238_v29  ;;  %v1502_v26 = vadd.f32 %v1501_v6, %v1375_v59  ;;  %v1379_v61 = vmul.f32 %v2283_v15, %v2283_v15  ;;  %v1392_v6 = vmul.f32 %v2353_v60, %v2353_v60 }
 0x1ac   :  { %v1393_v59 = vmul.f32 %v1824_v51, %v1824_v51 }
 0x1ad   :  { %v1503_v1 = vadd.f32 %v1502_v26, %v1376_v55  ;;  %v1240_v9 = vadd.f32 %v2243_v22, %v1239_v42  ;;  %v1113_v26 = vpop.f32.mrf.mxu1 }
 0x1af   :  { %v1241_v63 = vadd.f32 %v1240_v9, %v2267_v57  ;;  %v1504_v36 = vadd.f32 %v1503_v1, %v1377_v45 }
 0x1b1   :  { %v1505_v30 = vadd.f32 %v1504_v36, %v1378_v58  ;;  %v1242_v3 = vadd.f32 %v1241_v63, %v2283_v15  ;;  %v1395_v63 = vmul.f32 %v1097_v8, %v1097_v8  ;;  %v1835_v58 = vpop.f32.mrf.mxu1  ;;  %v1396_v36 = vmul.f32 %v1827_v53, %v1827_v53 }
 0x1b3   :  { %v1243_v5 = vadd.f32 %v2259_v48, %v1242_v3  ;;  %v1506_v22 = vadd.f32 %v1505_v30, %v1379_v61  ;;  %v1383_v48 = vmul.f32 %v2315_v56, %v2315_v56  ;;  %v1397_v3 = vmul.f32 %v1828_v12, %v1828_v12 }
 0x1b5   :  { %v1507_v25 = vadd.f32 %v1506_v22, %v1380_v39  ;;  %v1244_v57 = vadd.f32 %v2275_v4, %v1243_v5  ;;  %v1126_v5 = vpop.f32.mrf.mxu1  ;;  %v1398_v22 = vmul.f32 %v1110_v41, %v1110_v41 }
 0x1b7   :  { %v1245_v52 = vadd.f32 %v1244_v57, %v2299_v37  ;;  %v1508_v15 = vadd.f32 %v1507_v25, %v1381_v54  ;;  %v1399_v57 = vmul.f32 %v1113_v26, %v1113_v26 }
 0x1b9   :  { %v1509_v17 = vadd.f32 %v1508_v15, %v1382_v13  ;;  %v1246_v18 = vadd.f32 %v1245_v52, %v2315_v56  ;;  %v1836_v52 = vpop.f32.mrf.mxu1 }
 0x1bb   :  { %v1247_v38 = vadd.f32 %v2291_v32, %v1246_v18  ;;  %v1510_v4 = vadd.f32 %v1509_v17, %v1383_v48  ;;  %v1388_v32 = vmul.f32 %v2323_v0, %v2323_v0  ;;  %v1401_v17 = vmul.f32 %v1832_v49, %v1832_v49 }
 0x1bd   :  { %v1511_v23 = vadd.f32 %v1510_v4, %v1384_v20  ;;  %v1248_v37 = vadd.f32 %v2307_v19, %v1247_v38  ;;  %v1389_v19 = vmul.f32 %v2339_v40, %v2339_v40  ;;  %v1129_v20 = vpop.f32.mrf.mxu1  ;;  %v1402_v38 = vmul.f32 %v1126_v5, %v1126_v5 }
 0x1bf   :  { %v1249_v14 = vadd.f32 %v1248_v37, %v2331_v7  ;;  %v1512_v56 = vadd.f32 %v1511_v23, %v1385_v21  ;;  %v1390_v7 = vmul.f32 %v1078_v47, %v1078_v47  ;;  %v1403_v23 = vmul.f32 %v1129_v20, %v1129_v20 }
 0x1c0   :  { %v1404_v37 = vmul.f32 %v1835_v58, %v1835_v58 }
 0x1c1   :  { %v1513_v46 = vadd.f32 %v1512_v56, %v1386_v28  ;;  %v1250_v33 = vadd.f32 %v1249_v14, %v1065_v27  ;;  %v1391_v27 = vmul.f32 %v1081_v62, %v1081_v62  ;;  %v1405_v28 = vmul.f32 %v1836_v52, %v1836_v52 }
 0x1c3   :  { %v1251_v2 = vadd.f32 %v2323_v0, %v1250_v33  ;;  %v1514_v34 = vadd.f32 %v1513_v46, %v1387_v35 }
 0x1c5   :  { %v1515_v31 = vadd.f32 %v1514_v34, %v1388_v32  ;;  %v1252_v16 = vadd.f32 %v2339_v40, %v1251_v2  ;;  %v1394_v40 = vmul.f32 %v1094_v11, %v1094_v11 }
 0x1c7   :  { %v1253_v43 = vadd.f32 %v1252_v16, %v1078_v47  ;;  %v1516_v10 = vadd.f32 %v1515_v31, %v1389_v19 }
 0x1c9   :  { %v1517_v50 = vadd.f32 %v1516_v10, %v1390_v7  ;;  %v1254_v44 = vadd.f32 %v1253_v43, %v1081_v62  ;;  %v1141_v43 = vld [vmem:[%s2423_s2] sm:$0x1] }
 0x1cb   :  { %v1255_v0 = vadd.f32 %v2353_v60, %v1254_v44  ;;  %v1518_v29 = vadd.f32 %v1517_v50, %v1391_v27  ;;  %v1277_v50 = vld [vmem:[%s2424_s3] sm:$0x1] }
 0x1cd   :  { %v1519_v55 = vadd.f32 %v1518_v29, %v1392_v6  ;;  %v1256_v42 = vadd.f32 %v1824_v51, %v1255_v0 }
 0x1cf   :  { %v1257_v45 = vadd.f32 %v1256_v42, %v1094_v11  ;;  %v1520_v1 = vadd.f32 %v1519_v55, %v1393_v59  ;;  %v1400_v11 = vmul.f32 %v1831_v24, %v1831_v24 }
 0x1d1   :  { %v1521_v9 = vadd.f32 %v1520_v1, %v1394_v40  ;;  %v1258_v47 = vadd.f32 %v1257_v45, %v1097_v8 }
 0x1d3   :  { %v1259_v62 = vadd.f32 %v1827_v53, %v1258_v47  ;;  %v1522_v30 = vadd.f32 %v1521_v9, %v1395_v63 }
 0x1d5   :  { %v1523_v61 = vadd.f32 %v1522_v30, %v1396_v36  ;;  %v1260_v39 = vadd.f32 %v1828_v12, %v1259_v62 }
 0x1d7   :  { %v1261_v60 = vadd.f32 %v1260_v39, %v1110_v41  ;;  %v1524_v54 = vadd.f32 %v1523_v61, %v1397_v3 }
 0x1d9   :  { %v1525_v25 = vadd.f32 %v1524_v54, %v1398_v22  ;;  %v1262_v51 = vadd.f32 %v1261_v60, %v1113_v26 }
 0x1db   :  { %v1263_v13 = vadd.f32 %v1831_v24, %v1262_v51  ;;  %v1526_v15 = vadd.f32 %v1525_v25, %v1399_v57 }
 0x1dd   :  { %v1527_v18 = vadd.f32 %v1526_v15, %v1400_v11  ;;  %v1264_v48 = vadd.f32 %v1832_v49, %v1263_v13 }
 0x1df   :  { %v1265_v53 = vadd.f32 %v1264_v48, %v1126_v5  ;;  %v1528_v4 = vadd.f32 %v1527_v18, %v1401_v17 }
 0x1e1   :  { %v1529_v21 = vadd.f32 %v1528_v4, %v1402_v38  ;;  %v1266_v12 = vadd.f32 %v1265_v53, %v1129_v20 }
 0x1e3   :  { %v1267_v8 = vadd.f32 %v1835_v58, %v1266_v12  ;;  %v1530_v14 = vadd.f32 %v1529_v21, %v1403_v23 }
 0x1e5   :  { %v1268_v56 = vadd.f32 %v1836_v52, %v1267_v8  ;;  %v1531_v46 = vadd.f32 %v1530_v14, %v1404_v37 }
 0x1e7   :  { %v1269_v33 = vrot.slane %v1268_v56, 4  ;;  %v1532_v35 = vadd.f32 %v1531_v46, %v1405_v28 }
 0x1e9   :  { %v1270_v24 = vadd.f32 %v1269_v33, %v1268_v56  ;;  %v1533_v32 = vrot.slane %v1532_v35, 4 }
 0x1eb   :  { %v1271_v2 = vrot.slane %v1270_v24, 2  ;;  %v1534_v34 = vadd.f32 %v1533_v32, %v1532_v35 }
 0x1ed   :  { %v1272_v19 = vadd.f32 %v1271_v2, %v1270_v24  ;;  %v1535_v31 = vrot.slane %v1534_v34, 2 }
 0x1ef   :  { %v1273_v16 = vrot.slane %v1272_v19, 1  ;;  %v1536_v41 = vadd.f32 %v1535_v31, %v1534_v34 }
 0x1f1   :  { %v1274_v7 = vadd.f32 %v1273_v16, %v1272_v19  ;;  %v1537_v10 = vrot.slane %v1536_v41, 1 }
 0x1f3   :  { %v1275_v44 = vadd.f32 %v1274_v7, %v1141_v43  ;;  %v1538_v27 = vadd.f32 %v1537_v10, %v1536_v41 }
 0x1f5   :  { %1276 = vst [vmem:[%s2423_s2] sm:$0x1] %v1275_v44  ;;  %v1539_v49 = vadd.f32 %v1538_v27, %v1277_v50 }
 0x1f7   :  { %1540 = vst [vmem:[%s2424_s3] sm:$0x1] %v1539_v49 }

// kernel: basic_conv_forward.3
= control target key start
LH: loop header
LB: loop body
LE: loop exit
PB: predicated region body
PF: predicated region fallthrough
CT: control target
= control target key end

     0   :  { %s2950_s1 = inlined_call_operand.vmem [shape: bf16[128,128], index: 1, kind: input, shape index: {}]   ;;  %s2951_s0 = inlined_call_operand.vmem [shape: bf16[1024,128], index: 0, kind: input, shape index: {}]   ;;  %s2952_s2 = inlined_call_operand.vmem [shape: f32[1,128], index: 2, kind: input, shape index: {}]   ;;  %s2953_s3 = inlined_call_operand.vmem [shape: f32[1,128], index: 3, kind: input, shape index: {}]   ;;  %s2954_s4 = inlined_call_operand.vmem [shape: f32[1024,128], index: 4, kind: output, shape index: {}]  }
   0x1   :  { %v1975_v0 = vld [vmem:[%s2950_s1 + $0x38] sm:$0xff]   ;;  %v1976_v1 = vld [vmem:[%s2950_s1 + $0x30] sm:$0xff]   ;;  %v1977_v2 = vld [vmem:[%s2950_s1 + $0x28] sm:$0xff]  }
   0x2   :  { %1815 = vmatprep.subr.bf16.mxu0 %v1975_v0  ;;  %1959 = vmatprep.subr.bf16.mxu1 %v1975_v0  ;;  %v1978_v3 = vld [vmem:[%s2950_s1 + $0x20] sm:$0xff]   ;;  %v1979_v6 = vld [vmem:[%s2950_s1 + $0x18] sm:$0xff]   ;;  %v1980_v7 = vld [vmem:[%s2950_s1 + $0x10] sm:$0xff]  }
   0x3   :  { %1816 = vmatpush3.bf16.msra.mxu0 %v1975_v0  ;;  %1967 = vmatpush3.bf16.msra.mxu1 %v1975_v0  ;;  %v1983_v4 = vld [vmem:[%s2951_s0] sm:$0xff]   ;;  %v1981_v8 = vld [vmem:[%s2950_s1 + $0x8] sm:$0xff]   ;;  %v1987_v12 = vld [vmem:[%s2951_s0 + $0x10] sm:$0xff]  }
   0x4   :  { %1817 = vmatprep.subr.bf16.mxu0 %v1976_v1  ;;  %1960 = vmatprep.subr.bf16.mxu1 %v1976_v1  ;;  %v1984_v5 = vld [vmem:[%s2951_s0 + $0x100] sm:$0xff]   ;;  %v1985_v10 = vld [vmem:[%s2951_s0 + $0x8] sm:$0xff]   ;;  %v1988_v13 = vld [vmem:[%s2951_s0 + $0x110] sm:$0xff]  }
   0x5   :  { %1831 = vmatprep.mubr.bf16.mxu0 %v1983_v4  ;;  %1895 = vmatprep.mubr.bf16.mxu1 %v1984_v5  ;;  %v1982_v9 = vld [vmem:[%s2950_s1] sm:$0xff]   ;;  %v1986_v11 = vld [vmem:[%s2951_s0 + $0x108] sm:$0xff]   ;;  %v1989_v14 = vld [vmem:[%s2951_s0 + $0x18] sm:$0xff]  }
   0x6   :  { %v1990_v15 = vld [vmem:[%s2951_s0 + $0x118] sm:$0xff]   ;;  %v1991_v16 = vld [vmem:[%s2951_s0 + $0x20] sm:$0xff]   ;;  %v1993_v18 = vld [vmem:[%s2951_s0 + $0x28] sm:$0xff]  }
   0x7   :  { %1818 = vmatpush3.bf16.msra.mxu0 %v1976_v1  ;;  %1968 = vmatpush3.bf16.msra.mxu1 %v1976_v1  ;;  %v1992_v17 = vld [vmem:[%s2951_s0 + $0x120] sm:$0xff]   ;;  %v1994_v19 = vld [vmem:[%s2951_s0 + $0x128] sm:$0xff]   ;;  %v1995_v20 = vld [vmem:[%s2951_s0 + $0x30] sm:$0xff]  }
   0x8   :  { %1819 = vmatprep.subr.bf16.mxu0 %v1977_v2  ;;  %1961 = vmatprep.subr.bf16.mxu1 %v1977_v2  ;;  %v1996_v21 = vld [vmem:[%s2951_s0 + $0x130] sm:$0xff]   ;;  %v1997_v22 = vld [vmem:[%s2951_s0 + $0x38] sm:$0xff]   ;;  %v1999_v24 = vld [vmem:[%s2951_s0 + $0x40] sm:$0xff]  }
   0x9   :  { %v1998_v23 = vld [vmem:[%s2951_s0 + $0x138] sm:$0xff]   ;;  %v2000_v25 = vld [vmem:[%s2951_s0 + $0x140] sm:$0xff]   ;;  %v2001_v26 = vld [vmem:[%s2951_s0 + $0x48] sm:$0xff]  }
   0xa   :  { %v2002_v27 = vld [vmem:[%s2951_s0 + $0x148] sm:$0xff]   ;;  %v2003_v28 = vld [vmem:[%s2951_s0 + $0x50] sm:$0xff]   ;;  %v2005_v30 = vld [vmem:[%s2951_s0 + $0x58] sm:$0xff]  }
   0xb   :  { %1820 = vmatpush3.bf16.msra.mxu0 %v1977_v2  ;;  %1969 = vmatpush3.bf16.msra.mxu1 %v1977_v2  ;;  %v2004_v29 = vld [vmem:[%s2951_s0 + $0x150] sm:$0xff]   ;;  %v2006_v31 = vld [vmem:[%s2951_s0 + $0x158] sm:$0xff]   ;;  %v2007_v32 = vld [vmem:[%s2951_s0 + $0x60] sm:$0xff]  }
   0xc   :  { %1821 = vmatprep.subr.bf16.mxu0 %v1978_v3  ;;  %1962 = vmatprep.subr.bf16.mxu1 %v1978_v3  ;;  %v2008_v33 = vld [vmem:[%s2951_s0 + $0x160] sm:$0xff]   ;;  %v2009_v34 = vld [vmem:[%s2951_s0 + $0x68] sm:$0xff]   ;;  %v2011_v36 = vld [vmem:[%s2951_s0 + $0x70] sm:$0xff]  }
   0xd   :  { %v2010_v35 = vld [vmem:[%s2951_s0 + $0x168] sm:$0xff]   ;;  %v2012_v37 = vld [vmem:[%s2951_s0 + $0x170] sm:$0xff]   ;;  %v2013_v38 = vld [vmem:[%s2951_s0 + $0x78] sm:$0xff]  }
   0xe   :  { %v2014_v39 = vld [vmem:[%s2951_s0 + $0x178] sm:$0xff]   ;;  %v2015_v40 = vld [vmem:[%s2951_s0 + $0x80] sm:$0xff]   ;;  %v2017_v42 = vld [vmem:[%s2951_s0 + $0x88] sm:$0xff]  }
   0xf   :  { %1822 = vmatpush3.bf16.msra.mxu0 %v1978_v3  ;;  %1970 = vmatpush3.bf16.msra.mxu1 %v1978_v3  ;;  %v2016_v41 = vld [vmem:[%s2951_s0 + $0x180] sm:$0xff]   ;;  %v2018_v43 = vld [vmem:[%s2951_s0 + $0x188] sm:$0xff]   ;;  %v2019_v44 = vld [vmem:[%s2951_s0 + $0x90] sm:$0xff]  }
  0x10   :  { %1823 = vmatprep.subr.bf16.mxu0 %v1979_v6  ;;  %1963 = vmatprep.subr.bf16.mxu1 %v1979_v6  ;;  %v2020_v45 = vld [vmem:[%s2951_s0 + $0x190] sm:$0xff]   ;;  %v2021_v46 = vld [vmem:[%s2951_s0 + $0x98] sm:$0xff]   ;;  %v2023_v48 = vld [vmem:[%s2951_s0 + $0xa0] sm:$0xff]  }
  0x11   :  { %v2022_v47 = vld [vmem:[%s2951_s0 + $0x198] sm:$0xff]   ;;  %v2024_v49 = vld [vmem:[%s2951_s0 + $0x1a0] sm:$0xff]   ;;  %v2025_v50 = vld [vmem:[%s2951_s0 + $0xa8] sm:$0xff]  }
  0x12   :  { %v2026_v51 = vld [vmem:[%s2951_s0 + $0x1a8] sm:$0xff]   ;;  %v2027_v52 = vld [vmem:[%s2951_s0 + $0xb0] sm:$0xff]   ;;  %v2029_v54 = vld [vmem:[%s2951_s0 + $0xb8] sm:$0xff]  }
  0x13   :  { %1824 = vmatpush3.bf16.msra.mxu0 %v1979_v6  ;;  %1971 = vmatpush3.bf16.msra.mxu1 %v1979_v6  ;;  %v2028_v53 = vld [vmem:[%s2951_s0 + $0x1b0] sm:$0xff]   ;;  %v2030_v55 = vld [vmem:[%s2951_s0 + $0x1b8] sm:$0xff]   ;;  %v2031_v56 = vld [vmem:[%s2951_s0 + $0xc0] sm:$0xff]  }
  0x14   :  { %1825 = vmatprep.subr.bf16.mxu0 %v1980_v7  ;;  %1964 = vmatprep.subr.bf16.mxu1 %v1980_v7  ;;  %v2032_v57 = vld [vmem:[%s2951_s0 + $0x1c0] sm:$0xff]   ;;  %v2033_v58 = vld [vmem:[%s2951_s0 + $0xc8] sm:$0xff]   ;;  %v2035_v60 = vld [vmem:[%s2951_s0 + $0xd0] sm:$0xff]  }
  0x15   :  { %v2034_v59 = vld [vmem:[%s2951_s0 + $0x1c8] sm:$0xff]   ;;  %v2036_v61 = vld [vmem:[%s2951_s0 + $0x1d0] sm:$0xff]   ;;  %v2037_v62 = vld [vmem:[%s2951_s0 + $0xd8] sm:$0xff]  }
  0x16   :  { %v2038_v63 = vld [vmem:[%s2951_s0 + $0x1d8] sm:$0xff]   ;;  %v2039_v0 = vld [vmem:[%s2951_s0 + $0xe0] sm:$0xff]   ;;  %v2041_v2 = vld [vmem:[%s2951_s0 + $0xe8] sm:$0xff]  }
  0x17   :  { %1826 = vmatpush3.bf16.msra.mxu0 %v1980_v7  ;;  %1972 = vmatpush3.bf16.msra.mxu1 %v1980_v7  ;;  %v2040_v1 = vld [vmem:[%s2951_s0 + $0x1e0] sm:$0xff]   ;;  %v2042_v3 = vld [vmem:[%s2951_s0 + $0x1e8] sm:$0xff]   ;;  %v2043_v4 = vld [vmem:[%s2951_s0 + $0xf0] sm:$0xff]  }
  0x18   :  { %1827 = vmatprep.subr.bf16.mxu0 %v1981_v8  ;;  %1965 = vmatprep.subr.bf16.mxu1 %v1981_v8  ;;  %v2044_v5 = vld [vmem:[%s2951_s0 + $0x1f0] sm:$0xff]   ;;  %v2045_v6 = vld [vmem:[%s2951_s0 + $0xf8] sm:$0xff]  }
  0x19   :  { %v2046_v7 = vld [vmem:[%s2951_s0 + $0x1f8] sm:$0xff]  }
  0x1b   :  { %1828 = vmatpush3.bf16.msra.mxu0 %v1981_v8  ;;  %1973 = vmatpush3.bf16.msra.mxu1 %v1981_v8  ;;  %v2293_v8 = vld [vmem:[%s2952_s2] ss:$0 sm:$0xff] }
  0x1c   :  { %1829 = vmatprep.subr.bf16.mxu0 %v1982_v9  ;;  %1966 = vmatprep.subr.bf16.mxu1 %v1982_v9 }
  0x1f   :  { %1830 = vmatpush3.bf16.msra.mxu0 %v1982_v9  ;;  %1974 = vmatpush3.bf16.msra.mxu1 %v1982_v9 }
  0x22   :  { %1832 = vmatmul.mubr.bf16.vlgmr.msra.gmra.mxu0 %v1985_v10  ;;  %1896 = vmatmul.mubr.bf16.vlgmr.msra.gmra.mxu1 %v1986_v11  ;;  %v2298_v10 = vld [vmem:[%s2953_s3] ss:$0 sm:$0xff] }
  0x23   :  { %1835 = vmatprep.mubr.bf16.mxu0 %v1987_v12  ;;  %1899 = vmatprep.mubr.bf16.mxu1 %v1988_v13 }
  0x2a   :  { %1836 = vmatmul.mubr.bf16.gmra.mxu0 %v1989_v14  ;;  %1900 = vmatmul.mubr.bf16.gmra.mxu1 %v1990_v15 }
  0x2b   :  { %1839 = vmatprep.mubr.bf16.mxu0 %v1991_v16  ;;  %1903 = vmatprep.mubr.bf16.mxu1 %v1992_v17 }
  0x32   :  { %1840 = vmatmul.mubr.bf16.gmra.mxu0 %v1993_v18  ;;  %1904 = vmatmul.mubr.bf16.gmra.mxu1 %v1994_v19 }
  0x33   :  { %1843 = vmatprep.mubr.bf16.mxu0 %v1995_v20  ;;  %1907 = vmatprep.mubr.bf16.mxu1 %v1996_v21 }
  0x3a   :  { %1844 = vmatmul.mubr.bf16.gmra.mxu0 %v1997_v22  ;;  %1908 = vmatmul.mubr.bf16.gmra.mxu1 %v1998_v23 }
  0x3b   :  { %1847 = vmatprep.mubr.bf16.mxu0 %v1999_v24  ;;  %1911 = vmatprep.mubr.bf16.mxu1 %v2000_v25 }
  0x42   :  { %1848 = vmatmul.mubr.bf16.gmra.mxu0 %v2001_v26  ;;  %1912 = vmatmul.mubr.bf16.gmra.mxu1 %v2002_v27 }
  0x43   :  { %1851 = vmatprep.mubr.bf16.mxu0 %v2003_v28  ;;  %1915 = vmatprep.mubr.bf16.mxu1 %v2004_v29 }
  0x4a   :  { %1852 = vmatmul.mubr.bf16.gmra.mxu0 %v2005_v30  ;;  %1916 = vmatmul.mubr.bf16.gmra.mxu1 %v2006_v31 }
  0x4b   :  { %1855 = vmatprep.mubr.bf16.mxu0 %v2007_v32  ;;  %1919 = vmatprep.mubr.bf16.mxu1 %v2008_v33 }
  0x52   :  { %1856 = vmatmul.mubr.bf16.gmra.mxu0 %v2009_v34  ;;  %1920 = vmatmul.mubr.bf16.gmra.mxu1 %v2010_v35 }
  0x53   :  { %1859 = vmatprep.mubr.bf16.mxu0 %v2011_v36  ;;  %1923 = vmatprep.mubr.bf16.mxu1 %v2012_v37 }
  0x5a   :  { %1860 = vmatmul.mubr.bf16.gmra.mxu0 %v2013_v38  ;;  %1924 = vmatmul.mubr.bf16.gmra.mxu1 %v2014_v39 }
  0x5b   :  { %1863 = vmatprep.mubr.bf16.mxu0 %v2015_v40  ;;  %1927 = vmatprep.mubr.bf16.mxu1 %v2016_v41 }
  0x62   :  { %1864 = vmatmul.mubr.bf16.gmra.mxu0 %v2017_v42  ;;  %1928 = vmatmul.mubr.bf16.gmra.mxu1 %v2018_v43 }
  0x63   :  { %1867 = vmatprep.mubr.bf16.mxu0 %v2019_v44  ;;  %1931 = vmatprep.mubr.bf16.mxu1 %v2020_v45 }
  0x6a   :  { %1868 = vmatmul.mubr.bf16.gmra.mxu0 %v2021_v46  ;;  %1932 = vmatmul.mubr.bf16.gmra.mxu1 %v2022_v47 }
  0x6b   :  { %1871 = vmatprep.mubr.bf16.mxu0 %v2023_v48  ;;  %1935 = vmatprep.mubr.bf16.mxu1 %v2024_v49 }
  0x72   :  { %1872 = vmatmul.mubr.bf16.gmra.mxu0 %v2025_v50  ;;  %1936 = vmatmul.mubr.bf16.gmra.mxu1 %v2026_v51 }
  0x73   :  { %1875 = vmatprep.mubr.bf16.mxu0 %v2027_v52  ;;  %1939 = vmatprep.mubr.bf16.mxu1 %v2028_v53 }
  0x7a   :  { %1876 = vmatmul.mubr.bf16.gmra.mxu0 %v2029_v54  ;;  %1940 = vmatmul.mubr.bf16.gmra.mxu1 %v2030_v55 }
  0x7b   :  { %1879 = vmatprep.mubr.bf16.mxu0 %v2031_v56  ;;  %1943 = vmatprep.mubr.bf16.mxu1 %v2032_v57 }
  0x82   :  { %1880 = vmatmul.mubr.bf16.gmra.mxu0 %v2033_v58  ;;  %1944 = vmatmul.mubr.bf16.gmra.mxu1 %v2034_v59 }
  0x83   :  { %1883 = vmatprep.mubr.bf16.mxu0 %v2035_v60  ;;  %1947 = vmatprep.mubr.bf16.mxu1 %v2036_v61 }
  0x8a   :  { %1884 = vmatmul.mubr.bf16.gmra.mxu0 %v2037_v62  ;;  %1948 = vmatmul.mubr.bf16.gmra.mxu1 %v2038_v63 }
  0x8b   :  { %1887 = vmatprep.mubr.bf16.mxu0 %v2039_v0  ;;  %1951 = vmatprep.mubr.bf16.mxu1 %v2040_v1 }
  0x92   :  { %1888 = vmatmul.mubr.bf16.gmra.mxu0 %v2041_v2  ;;  %1952 = vmatmul.mubr.bf16.gmra.mxu1 %v2042_v3 }
  0x93   :  { %1891 = vmatprep.mubr.bf16.mxu0 %v2043_v4  ;;  %1955 = vmatprep.mubr.bf16.mxu1 %v2044_v5 }
  0x9a   :  { %1892 = vmatmul.mubr.bf16.gmra.mxu0 %v2045_v6  ;;  %1956 = vmatmul.mubr.bf16.gmra.mxu1 %v2046_v7 }
  0xe2   :  { %v1833_v9 = vpop.f32.mrf.mxu0  ;;  %v1897_v11 = vpop.f32.mrf.mxu1 }
  0xe3   :  { %v1148_v12 = vmul.f32 %v1833_v9, %v2293_v8  ;;  %v1212_v13 = vmul.f32 %v1897_v11, %v2293_v8 }
  0xe4   :  { %v628_v14 = vpop.f32.mrf.mxu0  ;;  %v884_v15 = vpop.f32.mrf.mxu1 }
  0xe5   :  { %v1283_v16 = vadd.f32 %v2298_v10, %v1148_v12  ;;  %v1347_v17 = vadd.f32 %v2298_v10, %v1212_v13  ;;  %v1146_v18 = vmul.f32 %v2293_v8, %v628_v14  ;;  %v1210_v19 = vmul.f32 %v2293_v8, %v884_v15 }
  0xe6   :  { %v1834_v20 = vpop.f32.mrf.mxu0  ;;  %v1898_v21 = vpop.f32.mrf.mxu1 }
  0xe7   :  { %v1411_v22 = vmax.f32 %v1283_v16, 0.0  ;;  %v1475_v23 = vmax.f32 %v1347_v17, 0.0  ;;  %v1281_v24 = vadd.f32 %v2298_v10, %v1146_v18  ;;  %v1345_v25 = vadd.f32 %v2298_v10, %v1210_v19 }
  0xe8   :  { %v1149_v26 = vmul.f32 %v1834_v20, %v2293_v8  ;;  %v1213_v27 = vmul.f32 %v1898_v21, %v2293_v8  ;;  %v631_v28 = vpop.f32.mrf.mxu0  ;;  %v887_v29 = vpop.f32.mrf.mxu1 }
  0xe9   :  { %1539 = vst [vmem:[%s2954_s4 + $0x10] sm:$0xff] %v1411_v22  ;;  %1603 = vst [vmem:[%s2954_s4 + $0x210] sm:$0xff] %v1475_v23  ;;  %v1409_v30 = vmax.f32 %v1281_v24, 0.0  ;;  %v1473_v31 = vmax.f32 %v1345_v25, 0.0  ;;  %v1147_v32 = vmul.f32 %v2293_v8, %v631_v28  ;;  %v1211_v33 = vmul.f32 %v2293_v8, %v887_v29 }
  0xea   :  { %v1284_v34 = vadd.f32 %v2298_v10, %v1149_v26  ;;  %v1348_v35 = vadd.f32 %v2298_v10, %v1213_v27  ;;  %v1837_v36 = vpop.f32.mrf.mxu0  ;;  %v1901_v37 = vpop.f32.mrf.mxu1 }
  0xeb   :  { %1537 = vst [vmem:[%s2954_s4] sm:$0xff] %v1409_v30  ;;  %1601 = vst [vmem:[%s2954_s4 + $0x200] sm:$0xff] %v1473_v31  ;;  %v1282_v38 = vadd.f32 %v2298_v10, %v1147_v32  ;;  %v1346_v39 = vadd.f32 %v2298_v10, %v1211_v33  ;;  %v1152_v40 = vmul.f32 %v1837_v36, %v2293_v8 }
  0xec   :  { %v1216_v41 = vmul.f32 %v1901_v37, %v2293_v8  ;;  %v1412_v42 = vmax.f32 %v1284_v34, 0.0  ;;  %v1476_v43 = vmax.f32 %v1348_v35, 0.0  ;;  %v644_v44 = vpop.f32.mrf.mxu0  ;;  %v900_v45 = vpop.f32.mrf.mxu1 }
  0xed   :  { %v1410_v46 = vmax.f32 %v1282_v38, 0.0  ;;  %v1474_v47 = vmax.f32 %v1346_v39, 0.0  ;;  %v1287_v48 = vadd.f32 %v2298_v10, %v1152_v40  ;;  %v1150_v50 = vmul.f32 %v2293_v8, %v644_v44 }
  0xee   :  { %v1351_v49 = vadd.f32 %v2298_v10, %v1216_v41  ;;  %1540 = vst [vmem:[%s2954_s4 + $0x18] sm:$0xff] %v1412_v42  ;;  %1604 = vst [vmem:[%s2954_s4 + $0x218] sm:$0xff] %v1476_v43  ;;  %v1214_v51 = vmul.f32 %v2293_v8, %v900_v45  ;;  %v1838_v52 = vpop.f32.mrf.mxu0  ;;  %v1902_v53 = vpop.f32.mrf.mxu1 }
  0xef   :  { %1538 = vst [vmem:[%s2954_s4 + $0x8] sm:$0xff] %v1410_v46  ;;  %1602 = vst [vmem:[%s2954_s4 + $0x208] sm:$0xff] %v1474_v47  ;;  %v1415_v54 = vmax.f32 %v1287_v48, 0.0  ;;  %v1153_v56 = vmul.f32 %v1838_v52, %v2293_v8  ;;  %v1217_v57 = vmul.f32 %v1902_v53, %v2293_v8  ;;  %v1285_v58 = vadd.f32 %v2298_v10, %v1150_v50 }
  0xf0   :  { %v1479_v55 = vmax.f32 %v1351_v49, 0.0  ;;  %v1349_v59 = vadd.f32 %v2298_v10, %v1214_v51  ;;  %v647_v60 = vpop.f32.mrf.mxu0  ;;  %v903_v61 = vpop.f32.mrf.mxu1 }
  0xf1   :  { %1543 = vst [vmem:[%s2954_s4 + $0x30] sm:$0xff] %v1415_v54  ;;  %v1288_v62 = vadd.f32 %v2298_v10, %v1153_v56  ;;  %v1352_v63 = vadd.f32 %v2298_v10, %v1217_v57  ;;  %v1151_v0 = vmul.f32 %v2293_v8, %v647_v60  ;;  %v1215_v1 = vmul.f32 %v2293_v8, %v903_v61 }
  0xf2   :  { %1607 = vst [vmem:[%s2954_s4 + $0x230] sm:$0xff] %v1479_v55  ;;  %v1413_v2 = vmax.f32 %v1285_v58, 0.0  ;;  %v1477_v3 = vmax.f32 %v1349_v59, 0.0  ;;  %v1841_v4 = vpop.f32.mrf.mxu0  ;;  %v1905_v5 = vpop.f32.mrf.mxu1 }
  0xf3   :  { %v1416_v6 = vmax.f32 %v1288_v62, 0.0  ;;  %v1480_v7 = vmax.f32 %v1352_v63, 0.0  ;;  %v1286_v9 = vadd.f32 %v2298_v10, %v1151_v0  ;;  %v1350_v11 = vadd.f32 %v2298_v10, %v1215_v1 }
  0xf4   :  { %1541 = vst [vmem:[%s2954_s4 + $0x20] sm:$0xff] %v1413_v2  ;;  %1605 = vst [vmem:[%s2954_s4 + $0x220] sm:$0xff] %v1477_v3  ;;  %v1156_v12 = vmul.f32 %v1841_v4, %v2293_v8  ;;  %v1220_v13 = vmul.f32 %v1905_v5, %v2293_v8  ;;  %v660_v14 = vpop.f32.mrf.mxu0  ;;  %v916_v15 = vpop.f32.mrf.mxu1 }
  0xf5   :  { %1544 = vst [vmem:[%s2954_s4 + $0x38] sm:$0xff] %v1416_v6  ;;  %1608 = vst [vmem:[%s2954_s4 + $0x238] sm:$0xff] %v1480_v7  ;;  %v1414_v16 = vmax.f32 %v1286_v9, 0.0  ;;  %v1478_v17 = vmax.f32 %v1350_v11, 0.0  ;;  %v1154_v18 = vmul.f32 %v2293_v8, %v660_v14  ;;  %v1218_v19 = vmul.f32 %v2293_v8, %v916_v15 }
  0xf6   :  { %v1291_v20 = vadd.f32 %v2298_v10, %v1156_v12  ;;  %v1355_v21 = vadd.f32 %v2298_v10, %v1220_v13  ;;  %v1842_v22 = vpop.f32.mrf.mxu0  ;;  %v1906_v23 = vpop.f32.mrf.mxu1 }
  0xf7   :  { %1542 = vst [vmem:[%s2954_s4 + $0x28] sm:$0xff] %v1414_v16  ;;  %1606 = vst [vmem:[%s2954_s4 + $0x228] sm:$0xff] %v1478_v17  ;;  %v1289_v24 = vadd.f32 %v2298_v10, %v1154_v18  ;;  %v1353_v25 = vadd.f32 %v2298_v10, %v1218_v19  ;;  %v1157_v26 = vmul.f32 %v1842_v22, %v2293_v8 }
  0xf8   :  { %v1221_v27 = vmul.f32 %v1906_v23, %v2293_v8  ;;  %v1419_v28 = vmax.f32 %v1291_v20, 0.0  ;;  %v1483_v29 = vmax.f32 %v1355_v21, 0.0  ;;  %v663_v30 = vpop.f32.mrf.mxu0  ;;  %v919_v31 = vpop.f32.mrf.mxu1 }
  0xf9   :  { %v1417_v32 = vmax.f32 %v1289_v24, 0.0  ;;  %v1481_v33 = vmax.f32 %v1353_v25, 0.0  ;;  %v1292_v34 = vadd.f32 %v2298_v10, %v1157_v26  ;;  %v1155_v36 = vmul.f32 %v2293_v8, %v663_v30 }
  0xfa   :  { %v1356_v35 = vadd.f32 %v2298_v10, %v1221_v27  ;;  %1547 = vst [vmem:[%s2954_s4 + $0x50] sm:$0xff] %v1419_v28  ;;  %1611 = vst [vmem:[%s2954_s4 + $0x250] sm:$0xff] %v1483_v29  ;;  %v1219_v37 = vmul.f32 %v2293_v8, %v919_v31  ;;  %v1845_v38 = vpop.f32.mrf.mxu0  ;;  %v1909_v39 = vpop.f32.mrf.mxu1 }
  0xfb   :  { %1545 = vst [vmem:[%s2954_s4 + $0x40] sm:$0xff] %v1417_v32  ;;  %1609 = vst [vmem:[%s2954_s4 + $0x240] sm:$0xff] %v1481_v33  ;;  %v1420_v40 = vmax.f32 %v1292_v34, 0.0  ;;  %v1160_v42 = vmul.f32 %v1845_v38, %v2293_v8  ;;  %v1224_v43 = vmul.f32 %v1909_v39, %v2293_v8  ;;  %v1290_v44 = vadd.f32 %v2298_v10, %v1155_v36 }
  0xfc   :  { %v1484_v41 = vmax.f32 %v1356_v35, 0.0  ;;  %v1354_v45 = vadd.f32 %v2298_v10, %v1219_v37  ;;  %v676_v46 = vpop.f32.mrf.mxu0  ;;  %v932_v47 = vpop.f32.mrf.mxu1 }
  0xfd   :  { %1548 = vst [vmem:[%s2954_s4 + $0x58] sm:$0xff] %v1420_v40  ;;  %v1295_v48 = vadd.f32 %v2298_v10, %v1160_v42  ;;  %v1359_v49 = vadd.f32 %v2298_v10, %v1224_v43  ;;  %v1158_v50 = vmul.f32 %v2293_v8, %v676_v46  ;;  %v1222_v51 = vmul.f32 %v2293_v8, %v932_v47 }
  0xfe   :  { %1612 = vst [vmem:[%s2954_s4 + $0x258] sm:$0xff] %v1484_v41  ;;  %v1418_v52 = vmax.f32 %v1290_v44, 0.0  ;;  %v1482_v53 = vmax.f32 %v1354_v45, 0.0  ;;  %v1846_v54 = vpop.f32.mrf.mxu0  ;;  %v1910_v55 = vpop.f32.mrf.mxu1 }
  0xff   :  { %v1423_v56 = vmax.f32 %v1295_v48, 0.0  ;;  %v1487_v57 = vmax.f32 %v1359_v49, 0.0  ;;  %v1293_v58 = vadd.f32 %v2298_v10, %v1158_v50  ;;  %v1357_v59 = vadd.f32 %v2298_v10, %v1222_v51 }
 0x100   :  { %1546 = vst [vmem:[%s2954_s4 + $0x48] sm:$0xff] %v1418_v52  ;;  %1610 = vst [vmem:[%s2954_s4 + $0x248] sm:$0xff] %v1482_v53  ;;  %v1161_v60 = vmul.f32 %v1846_v54, %v2293_v8  ;;  %v1225_v61 = vmul.f32 %v1910_v55, %v2293_v8  ;;  %v679_v62 = vpop.f32.mrf.mxu0  ;;  %v935_v63 = vpop.f32.mrf.mxu1 }
 0x101   :  { %1551 = vst [vmem:[%s2954_s4 + $0x70] sm:$0xff] %v1423_v56  ;;  %1615 = vst [vmem:[%s2954_s4 + $0x270] sm:$0xff] %v1487_v57  ;;  %v1421_v0 = vmax.f32 %v1293_v58, 0.0  ;;  %v1485_v1 = vmax.f32 %v1357_v59, 0.0  ;;  %v1159_v2 = vmul.f32 %v2293_v8, %v679_v62  ;;  %v1223_v3 = vmul.f32 %v2293_v8, %v935_v63 }
 0x102   :  { %v1296_v4 = vadd.f32 %v2298_v10, %v1161_v60  ;;  %v1360_v5 = vadd.f32 %v2298_v10, %v1225_v61  ;;  %v1849_v6 = vpop.f32.mrf.mxu0  ;;  %v1913_v7 = vpop.f32.mrf.mxu1 }
 0x103   :  { %1549 = vst [vmem:[%s2954_s4 + $0x60] sm:$0xff] %v1421_v0  ;;  %1613 = vst [vmem:[%s2954_s4 + $0x260] sm:$0xff] %v1485_v1  ;;  %v1294_v9 = vadd.f32 %v2298_v10, %v1159_v2  ;;  %v1358_v11 = vadd.f32 %v2298_v10, %v1223_v3  ;;  %v1164_v12 = vmul.f32 %v1849_v6, %v2293_v8 }
 0x104   :  { %v1228_v13 = vmul.f32 %v1913_v7, %v2293_v8  ;;  %v1424_v14 = vmax.f32 %v1296_v4, 0.0  ;;  %v1488_v15 = vmax.f32 %v1360_v5, 0.0  ;;  %v692_v16 = vpop.f32.mrf.mxu0  ;;  %v948_v17 = vpop.f32.mrf.mxu1 }
 0x105   :  { %v1422_v18 = vmax.f32 %v1294_v9, 0.0  ;;  %v1486_v19 = vmax.f32 %v1358_v11, 0.0  ;;  %v1299_v20 = vadd.f32 %v2298_v10, %v1164_v12  ;;  %v1162_v22 = vmul.f32 %v2293_v8, %v692_v16 }
 0x106   :  { %v1363_v21 = vadd.f32 %v2298_v10, %v1228_v13  ;;  %1552 = vst [vmem:[%s2954_s4 + $0x78] sm:$0xff] %v1424_v14  ;;  %1616 = vst [vmem:[%s2954_s4 + $0x278] sm:$0xff] %v1488_v15  ;;  %v1226_v23 = vmul.f32 %v2293_v8, %v948_v17  ;;  %v1850_v24 = vpop.f32.mrf.mxu0  ;;  %v1914_v25 = vpop.f32.mrf.mxu1 }
 0x107   :  { %1550 = vst [vmem:[%s2954_s4 + $0x68] sm:$0xff] %v1422_v18  ;;  %1614 = vst [vmem:[%s2954_s4 + $0x268] sm:$0xff] %v1486_v19  ;;  %v1427_v26 = vmax.f32 %v1299_v20, 0.0  ;;  %v1165_v28 = vmul.f32 %v1850_v24, %v2293_v8  ;;  %v1229_v29 = vmul.f32 %v1914_v25, %v2293_v8  ;;  %v1297_v30 = vadd.f32 %v2298_v10, %v1162_v22 }
 0x108   :  { %v1491_v27 = vmax.f32 %v1363_v21, 0.0  ;;  %v1361_v31 = vadd.f32 %v2298_v10, %v1226_v23  ;;  %v695_v32 = vpop.f32.mrf.mxu0  ;;  %v951_v33 = vpop.f32.mrf.mxu1 }
 0x109   :  { %1555 = vst [vmem:[%s2954_s4 + $0x90] sm:$0xff] %v1427_v26  ;;  %v1300_v34 = vadd.f32 %v2298_v10, %v1165_v28  ;;  %v1364_v35 = vadd.f32 %v2298_v10, %v1229_v29  ;;  %v1163_v36 = vmul.f32 %v2293_v8, %v695_v32  ;;  %v1227_v37 = vmul.f32 %v2293_v8, %v951_v33 }
 0x10a   :  { %1619 = vst [vmem:[%s2954_s4 + $0x290] sm:$0xff] %v1491_v27  ;;  %v1425_v38 = vmax.f32 %v1297_v30, 0.0  ;;  %v1489_v39 = vmax.f32 %v1361_v31, 0.0  ;;  %v1853_v40 = vpop.f32.mrf.mxu0  ;;  %v1917_v41 = vpop.f32.mrf.mxu1 }
 0x10b   :  { %v1428_v42 = vmax.f32 %v1300_v34, 0.0  ;;  %v1492_v43 = vmax.f32 %v1364_v35, 0.0  ;;  %v1298_v44 = vadd.f32 %v2298_v10, %v1163_v36  ;;  %v1362_v45 = vadd.f32 %v2298_v10, %v1227_v37 }
 0x10c   :  { %1553 = vst [vmem:[%s2954_s4 + $0x80] sm:$0xff] %v1425_v38  ;;  %1617 = vst [vmem:[%s2954_s4 + $0x280] sm:$0xff] %v1489_v39  ;;  %v1168_v46 = vmul.f32 %v1853_v40, %v2293_v8  ;;  %v1232_v47 = vmul.f32 %v1917_v41, %v2293_v8  ;;  %v708_v48 = vpop.f32.mrf.mxu0  ;;  %v964_v49 = vpop.f32.mrf.mxu1 }
 0x10d   :  { %1556 = vst [vmem:[%s2954_s4 + $0x98] sm:$0xff] %v1428_v42  ;;  %1620 = vst [vmem:[%s2954_s4 + $0x298] sm:$0xff] %v1492_v43  ;;  %v1426_v50 = vmax.f32 %v1298_v44, 0.0  ;;  %v1490_v51 = vmax.f32 %v1362_v45, 0.0  ;;  %v1166_v52 = vmul.f32 %v2293_v8, %v708_v48  ;;  %v1230_v53 = vmul.f32 %v2293_v8, %v964_v49 }
 0x10e   :  { %v1303_v54 = vadd.f32 %v2298_v10, %v1168_v46  ;;  %v1367_v55 = vadd.f32 %v2298_v10, %v1232_v47  ;;  %v1854_v56 = vpop.f32.mrf.mxu0  ;;  %v1918_v57 = vpop.f32.mrf.mxu1 }
 0x10f   :  { %1554 = vst [vmem:[%s2954_s4 + $0x88] sm:$0xff] %v1426_v50  ;;  %1618 = vst [vmem:[%s2954_s4 + $0x288] sm:$0xff] %v1490_v51  ;;  %v1301_v58 = vadd.f32 %v2298_v10, %v1166_v52  ;;  %v1365_v59 = vadd.f32 %v2298_v10, %v1230_v53  ;;  %v1169_v60 = vmul.f32 %v1854_v56, %v2293_v8 }
 0x110   :  { %v1233_v61 = vmul.f32 %v1918_v57, %v2293_v8  ;;  %v1431_v62 = vmax.f32 %v1303_v54, 0.0  ;;  %v1495_v63 = vmax.f32 %v1367_v55, 0.0  ;;  %v711_v0 = vpop.f32.mrf.mxu0  ;;  %v967_v1 = vpop.f32.mrf.mxu1 }
 0x111   :  { %v1429_v2 = vmax.f32 %v1301_v58, 0.0  ;;  %v1493_v3 = vmax.f32 %v1365_v59, 0.0  ;;  %v1304_v4 = vadd.f32 %v2298_v10, %v1169_v60  ;;  %v1167_v6 = vmul.f32 %v2293_v8, %v711_v0 }
 0x112   :  { %v1368_v5 = vadd.f32 %v2298_v10, %v1233_v61  ;;  %1559 = vst [vmem:[%s2954_s4 + $0xb0] sm:$0xff] %v1431_v62  ;;  %1623 = vst [vmem:[%s2954_s4 + $0x2b0] sm:$0xff] %v1495_v63  ;;  %v1231_v7 = vmul.f32 %v2293_v8, %v967_v1  ;;  %v1857_v9 = vpop.f32.mrf.mxu0  ;;  %v1921_v11 = vpop.f32.mrf.mxu1 }
 0x113   :  { %1557 = vst [vmem:[%s2954_s4 + $0xa0] sm:$0xff] %v1429_v2  ;;  %1621 = vst [vmem:[%s2954_s4 + $0x2a0] sm:$0xff] %v1493_v3  ;;  %v1432_v12 = vmax.f32 %v1304_v4, 0.0  ;;  %v1172_v14 = vmul.f32 %v1857_v9, %v2293_v8  ;;  %v1236_v15 = vmul.f32 %v1921_v11, %v2293_v8  ;;  %v1302_v16 = vadd.f32 %v2298_v10, %v1167_v6 }
 0x114   :  { %v1496_v13 = vmax.f32 %v1368_v5, 0.0  ;;  %v1366_v17 = vadd.f32 %v2298_v10, %v1231_v7  ;;  %v724_v18 = vpop.f32.mrf.mxu0  ;;  %v980_v19 = vpop.f32.mrf.mxu1 }
 0x115   :  { %1560 = vst [vmem:[%s2954_s4 + $0xb8] sm:$0xff] %v1432_v12  ;;  %v1307_v20 = vadd.f32 %v2298_v10, %v1172_v14  ;;  %v1371_v21 = vadd.f32 %v2298_v10, %v1236_v15  ;;  %v1170_v22 = vmul.f32 %v2293_v8, %v724_v18  ;;  %v1234_v23 = vmul.f32 %v2293_v8, %v980_v19 }
 0x116   :  { %1624 = vst [vmem:[%s2954_s4 + $0x2b8] sm:$0xff] %v1496_v13  ;;  %v1430_v24 = vmax.f32 %v1302_v16, 0.0  ;;  %v1494_v25 = vmax.f32 %v1366_v17, 0.0  ;;  %v1858_v26 = vpop.f32.mrf.mxu0  ;;  %v1922_v27 = vpop.f32.mrf.mxu1 }
 0x117   :  { %v1435_v28 = vmax.f32 %v1307_v20, 0.0  ;;  %v1499_v29 = vmax.f32 %v1371_v21, 0.0  ;;  %v1305_v30 = vadd.f32 %v2298_v10, %v1170_v22  ;;  %v1369_v31 = vadd.f32 %v2298_v10, %v1234_v23 }
 0x118   :  { %1558 = vst [vmem:[%s2954_s4 + $0xa8] sm:$0xff] %v1430_v24  ;;  %1622 = vst [vmem:[%s2954_s4 + $0x2a8] sm:$0xff] %v1494_v25  ;;  %v1173_v32 = vmul.f32 %v1858_v26, %v2293_v8  ;;  %v1237_v33 = vmul.f32 %v1922_v27, %v2293_v8  ;;  %v727_v34 = vpop.f32.mrf.mxu0  ;;  %v983_v35 = vpop.f32.mrf.mxu1 }
 0x119   :  { %1563 = vst [vmem:[%s2954_s4 + $0xd0] sm:$0xff] %v1435_v28  ;;  %1627 = vst [vmem:[%s2954_s4 + $0x2d0] sm:$0xff] %v1499_v29  ;;  %v1433_v36 = vmax.f32 %v1305_v30, 0.0  ;;  %v1497_v37 = vmax.f32 %v1369_v31, 0.0  ;;  %v1171_v38 = vmul.f32 %v2293_v8, %v727_v34  ;;  %v1235_v39 = vmul.f32 %v2293_v8, %v983_v35 }
 0x11a   :  { %v1308_v40 = vadd.f32 %v2298_v10, %v1173_v32  ;;  %v1372_v41 = vadd.f32 %v2298_v10, %v1237_v33  ;;  %v1861_v42 = vpop.f32.mrf.mxu0  ;;  %v1925_v43 = vpop.f32.mrf.mxu1 }
 0x11b   :  { %1561 = vst [vmem:[%s2954_s4 + $0xc0] sm:$0xff] %v1433_v36  ;;  %1625 = vst [vmem:[%s2954_s4 + $0x2c0] sm:$0xff] %v1497_v37  ;;  %v1306_v44 = vadd.f32 %v2298_v10, %v1171_v38  ;;  %v1370_v45 = vadd.f32 %v2298_v10, %v1235_v39  ;;  %v1176_v46 = vmul.f32 %v1861_v42, %v2293_v8 }
 0x11c   :  { %v1240_v47 = vmul.f32 %v1925_v43, %v2293_v8  ;;  %v1436_v48 = vmax.f32 %v1308_v40, 0.0  ;;  %v1500_v49 = vmax.f32 %v1372_v41, 0.0  ;;  %v740_v50 = vpop.f32.mrf.mxu0  ;;  %v996_v51 = vpop.f32.mrf.mxu1 }
 0x11d   :  { %v1434_v52 = vmax.f32 %v1306_v44, 0.0  ;;  %v1498_v53 = vmax.f32 %v1370_v45, 0.0  ;;  %v1311_v54 = vadd.f32 %v2298_v10, %v1176_v46  ;;  %v1174_v56 = vmul.f32 %v2293_v8, %v740_v50 }
 0x11e   :  { %v1375_v55 = vadd.f32 %v2298_v10, %v1240_v47  ;;  %1564 = vst [vmem:[%s2954_s4 + $0xd8] sm:$0xff] %v1436_v48  ;;  %1628 = vst [vmem:[%s2954_s4 + $0x2d8] sm:$0xff] %v1500_v49  ;;  %v1238_v57 = vmul.f32 %v2293_v8, %v996_v51  ;;  %v1862_v58 = vpop.f32.mrf.mxu0  ;;  %v1926_v59 = vpop.f32.mrf.mxu1 }
 0x11f   :  { %1562 = vst [vmem:[%s2954_s4 + $0xc8] sm:$0xff] %v1434_v52  ;;  %1626 = vst [vmem:[%s2954_s4 + $0x2c8] sm:$0xff] %v1498_v53  ;;  %v1439_v60 = vmax.f32 %v1311_v54, 0.0  ;;  %v1177_v62 = vmul.f32 %v1862_v58, %v2293_v8  ;;  %v1241_v63 = vmul.f32 %v1926_v59, %v2293_v8  ;;  %v1309_v0 = vadd.f32 %v2298_v10, %v1174_v56 }
 0x120   :  { %v1503_v61 = vmax.f32 %v1375_v55, 0.0  ;;  %v1373_v1 = vadd.f32 %v2298_v10, %v1238_v57  ;;  %v743_v2 = vpop.f32.mrf.mxu0  ;;  %v999_v3 = vpop.f32.mrf.mxu1 }
 0x121   :  { %1567 = vst [vmem:[%s2954_s4 + $0xf0] sm:$0xff] %v1439_v60  ;;  %v1312_v4 = vadd.f32 %v2298_v10, %v1177_v62  ;;  %v1376_v5 = vadd.f32 %v2298_v10, %v1241_v63  ;;  %v1175_v6 = vmul.f32 %v2293_v8, %v743_v2  ;;  %v1239_v7 = vmul.f32 %v2293_v8, %v999_v3 }
 0x122   :  { %1631 = vst [vmem:[%s2954_s4 + $0x2f0] sm:$0xff] %v1503_v61  ;;  %v1437_v9 = vmax.f32 %v1309_v0, 0.0  ;;  %v1501_v11 = vmax.f32 %v1373_v1, 0.0  ;;  %v1865_v12 = vpop.f32.mrf.mxu0  ;;  %v1929_v13 = vpop.f32.mrf.mxu1 }
 0x123   :  { %v1440_v14 = vmax.f32 %v1312_v4, 0.0  ;;  %v1504_v15 = vmax.f32 %v1376_v5, 0.0  ;;  %v1310_v16 = vadd.f32 %v2298_v10, %v1175_v6  ;;  %v1374_v17 = vadd.f32 %v2298_v10, %v1239_v7 }
 0x124   :  { %1565 = vst [vmem:[%s2954_s4 + $0xe0] sm:$0xff] %v1437_v9  ;;  %1629 = vst [vmem:[%s2954_s4 + $0x2e0] sm:$0xff] %v1501_v11  ;;  %v1180_v18 = vmul.f32 %v1865_v12, %v2293_v8  ;;  %v1244_v19 = vmul.f32 %v1929_v13, %v2293_v8  ;;  %v756_v20 = vpop.f32.mrf.mxu0  ;;  %v1012_v21 = vpop.f32.mrf.mxu1 }
 0x125   :  { %1568 = vst [vmem:[%s2954_s4 + $0xf8] sm:$0xff] %v1440_v14  ;;  %1632 = vst [vmem:[%s2954_s4 + $0x2f8] sm:$0xff] %v1504_v15  ;;  %v1438_v22 = vmax.f32 %v1310_v16, 0.0  ;;  %v1502_v23 = vmax.f32 %v1374_v17, 0.0  ;;  %v1178_v24 = vmul.f32 %v2293_v8, %v756_v20  ;;  %v1242_v25 = vmul.f32 %v2293_v8, %v1012_v21 }
 0x126   :  { %v1315_v26 = vadd.f32 %v2298_v10, %v1180_v18  ;;  %v1379_v27 = vadd.f32 %v2298_v10, %v1244_v19  ;;  %v1866_v28 = vpop.f32.mrf.mxu0  ;;  %v1930_v29 = vpop.f32.mrf.mxu1 }
 0x127   :  { %1566 = vst [vmem:[%s2954_s4 + $0xe8] sm:$0xff] %v1438_v22  ;;  %1630 = vst [vmem:[%s2954_s4 + $0x2e8] sm:$0xff] %v1502_v23  ;;  %v1313_v30 = vadd.f32 %v2298_v10, %v1178_v24  ;;  %v1377_v31 = vadd.f32 %v2298_v10, %v1242_v25  ;;  %v1181_v32 = vmul.f32 %v1866_v28, %v2293_v8 }
 0x128   :  { %v1245_v33 = vmul.f32 %v1930_v29, %v2293_v8  ;;  %v1443_v34 = vmax.f32 %v1315_v26, 0.0  ;;  %v1507_v35 = vmax.f32 %v1379_v27, 0.0  ;;  %v759_v36 = vpop.f32.mrf.mxu0  ;;  %v1015_v37 = vpop.f32.mrf.mxu1 }
 0x129   :  { %v1441_v38 = vmax.f32 %v1313_v30, 0.0  ;;  %v1505_v39 = vmax.f32 %v1377_v31, 0.0  ;;  %v1316_v40 = vadd.f32 %v2298_v10, %v1181_v32  ;;  %v1179_v42 = vmul.f32 %v2293_v8, %v759_v36 }
 0x12a   :  { %v1380_v41 = vadd.f32 %v2298_v10, %v1245_v33  ;;  %1571 = vst [vmem:[%s2954_s4 + $0x110] sm:$0xff] %v1443_v34  ;;  %1635 = vst [vmem:[%s2954_s4 + $0x310] sm:$0xff] %v1507_v35  ;;  %v1243_v43 = vmul.f32 %v2293_v8, %v1015_v37  ;;  %v1869_v44 = vpop.f32.mrf.mxu0  ;;  %v1933_v45 = vpop.f32.mrf.mxu1 }
 0x12b   :  { %1569 = vst [vmem:[%s2954_s4 + $0x100] sm:$0xff] %v1441_v38  ;;  %1633 = vst [vmem:[%s2954_s4 + $0x300] sm:$0xff] %v1505_v39  ;;  %v1444_v46 = vmax.f32 %v1316_v40, 0.0  ;;  %v1184_v48 = vmul.f32 %v1869_v44, %v2293_v8  ;;  %v1248_v49 = vmul.f32 %v1933_v45, %v2293_v8  ;;  %v1314_v50 = vadd.f32 %v2298_v10, %v1179_v42 }
 0x12c   :  { %v1508_v47 = vmax.f32 %v1380_v41, 0.0  ;;  %v1378_v51 = vadd.f32 %v2298_v10, %v1243_v43  ;;  %v772_v52 = vpop.f32.mrf.mxu0  ;;  %v1028_v53 = vpop.f32.mrf.mxu1 }
 0x12d   :  { %1572 = vst [vmem:[%s2954_s4 + $0x118] sm:$0xff] %v1444_v46  ;;  %v1319_v54 = vadd.f32 %v2298_v10, %v1184_v48  ;;  %v1383_v55 = vadd.f32 %v2298_v10, %v1248_v49  ;;  %v1182_v56 = vmul.f32 %v2293_v8, %v772_v52  ;;  %v1246_v57 = vmul.f32 %v2293_v8, %v1028_v53 }
 0x12e   :  { %1636 = vst [vmem:[%s2954_s4 + $0x318] sm:$0xff] %v1508_v47  ;;  %v1442_v58 = vmax.f32 %v1314_v50, 0.0  ;;  %v1506_v59 = vmax.f32 %v1378_v51, 0.0  ;;  %v1870_v60 = vpop.f32.mrf.mxu0  ;;  %v1934_v61 = vpop.f32.mrf.mxu1 }
 0x12f   :  { %v1447_v62 = vmax.f32 %v1319_v54, 0.0  ;;  %v1511_v63 = vmax.f32 %v1383_v55, 0.0  ;;  %v1317_v0 = vadd.f32 %v2298_v10, %v1182_v56  ;;  %v1381_v1 = vadd.f32 %v2298_v10, %v1246_v57 }
 0x130   :  { %1570 = vst [vmem:[%s2954_s4 + $0x108] sm:$0xff] %v1442_v58  ;;  %1634 = vst [vmem:[%s2954_s4 + $0x308] sm:$0xff] %v1506_v59  ;;  %v1185_v2 = vmul.f32 %v1870_v60, %v2293_v8  ;;  %v1249_v3 = vmul.f32 %v1934_v61, %v2293_v8  ;;  %v775_v4 = vpop.f32.mrf.mxu0  ;;  %v1031_v5 = vpop.f32.mrf.mxu1 }
 0x131   :  { %1575 = vst [vmem:[%s2954_s4 + $0x130] sm:$0xff] %v1447_v62  ;;  %1639 = vst [vmem:[%s2954_s4 + $0x330] sm:$0xff] %v1511_v63  ;;  %v1445_v6 = vmax.f32 %v1317_v0, 0.0  ;;  %v1509_v7 = vmax.f32 %v1381_v1, 0.0  ;;  %v1183_v9 = vmul.f32 %v2293_v8, %v775_v4  ;;  %v1247_v11 = vmul.f32 %v2293_v8, %v1031_v5 }
 0x132   :  { %v1320_v12 = vadd.f32 %v2298_v10, %v1185_v2  ;;  %v1384_v13 = vadd.f32 %v2298_v10, %v1249_v3  ;;  %v1873_v14 = vpop.f32.mrf.mxu0  ;;  %v1937_v15 = vpop.f32.mrf.mxu1 }
 0x133   :  { %1573 = vst [vmem:[%s2954_s4 + $0x120] sm:$0xff] %v1445_v6  ;;  %1637 = vst [vmem:[%s2954_s4 + $0x320] sm:$0xff] %v1509_v7  ;;  %v1318_v16 = vadd.f32 %v2298_v10, %v1183_v9  ;;  %v1382_v17 = vadd.f32 %v2298_v10, %v1247_v11  ;;  %v1188_v18 = vmul.f32 %v1873_v14, %v2293_v8 }
 0x134   :  { %v1252_v19 = vmul.f32 %v1937_v15, %v2293_v8  ;;  %v1448_v20 = vmax.f32 %v1320_v12, 0.0  ;;  %v1512_v21 = vmax.f32 %v1384_v13, 0.0  ;;  %v788_v22 = vpop.f32.mrf.mxu0  ;;  %v1044_v23 = vpop.f32.mrf.mxu1 }
 0x135   :  { %v1446_v24 = vmax.f32 %v1318_v16, 0.0  ;;  %v1510_v25 = vmax.f32 %v1382_v17, 0.0  ;;  %v1323_v26 = vadd.f32 %v2298_v10, %v1188_v18  ;;  %v1186_v28 = vmul.f32 %v2293_v8, %v788_v22 }
 0x136   :  { %v1387_v27 = vadd.f32 %v2298_v10, %v1252_v19  ;;  %1576 = vst [vmem:[%s2954_s4 + $0x138] sm:$0xff] %v1448_v20  ;;  %1640 = vst [vmem:[%s2954_s4 + $0x338] sm:$0xff] %v1512_v21  ;;  %v1250_v29 = vmul.f32 %v2293_v8, %v1044_v23  ;;  %v1874_v30 = vpop.f32.mrf.mxu0  ;;  %v1938_v31 = vpop.f32.mrf.mxu1 }
 0x137   :  { %1574 = vst [vmem:[%s2954_s4 + $0x128] sm:$0xff] %v1446_v24  ;;  %1638 = vst [vmem:[%s2954_s4 + $0x328] sm:$0xff] %v1510_v25  ;;  %v1451_v32 = vmax.f32 %v1323_v26, 0.0  ;;  %v1189_v34 = vmul.f32 %v1874_v30, %v2293_v8  ;;  %v1253_v35 = vmul.f32 %v1938_v31, %v2293_v8  ;;  %v1321_v36 = vadd.f32 %v2298_v10, %v1186_v28 }
 0x138   :  { %v1515_v33 = vmax.f32 %v1387_v27, 0.0  ;;  %v1385_v37 = vadd.f32 %v2298_v10, %v1250_v29  ;;  %v791_v38 = vpop.f32.mrf.mxu0  ;;  %v1047_v39 = vpop.f32.mrf.mxu1 }
 0x139   :  { %1579 = vst [vmem:[%s2954_s4 + $0x150] sm:$0xff] %v1451_v32  ;;  %v1324_v40 = vadd.f32 %v2298_v10, %v1189_v34  ;;  %v1388_v41 = vadd.f32 %v2298_v10, %v1253_v35  ;;  %v1187_v42 = vmul.f32 %v2293_v8, %v791_v38  ;;  %v1251_v43 = vmul.f32 %v2293_v8, %v1047_v39 }
 0x13a   :  { %1643 = vst [vmem:[%s2954_s4 + $0x350] sm:$0xff] %v1515_v33  ;;  %v1449_v44 = vmax.f32 %v1321_v36, 0.0  ;;  %v1513_v45 = vmax.f32 %v1385_v37, 0.0  ;;  %v1877_v46 = vpop.f32.mrf.mxu0  ;;  %v1941_v47 = vpop.f32.mrf.mxu1 }
 0x13b   :  { %v1452_v48 = vmax.f32 %v1324_v40, 0.0  ;;  %v1516_v49 = vmax.f32 %v1388_v41, 0.0  ;;  %v1322_v50 = vadd.f32 %v2298_v10, %v1187_v42  ;;  %v1386_v51 = vadd.f32 %v2298_v10, %v1251_v43 }
 0x13c   :  { %1577 = vst [vmem:[%s2954_s4 + $0x140] sm:$0xff] %v1449_v44  ;;  %1641 = vst [vmem:[%s2954_s4 + $0x340] sm:$0xff] %v1513_v45  ;;  %v1192_v52 = vmul.f32 %v1877_v46, %v2293_v8  ;;  %v1256_v53 = vmul.f32 %v1941_v47, %v2293_v8  ;;  %v804_v54 = vpop.f32.mrf.mxu0  ;;  %v1060_v55 = vpop.f32.mrf.mxu1 }
 0x13d   :  { %1580 = vst [vmem:[%s2954_s4 + $0x158] sm:$0xff] %v1452_v48  ;;  %1644 = vst [vmem:[%s2954_s4 + $0x358] sm:$0xff] %v1516_v49  ;;  %v1450_v56 = vmax.f32 %v1322_v50, 0.0  ;;  %v1514_v57 = vmax.f32 %v1386_v51, 0.0  ;;  %v1190_v58 = vmul.f32 %v2293_v8, %v804_v54  ;;  %v1254_v59 = vmul.f32 %v2293_v8, %v1060_v55  ;;  %v2809_v50 = vld [vmem:[%s2953_s3] ss:$0 sm:$0xff] }
 0x13e   :  { %v1327_v60 = vadd.f32 %v2298_v10, %v1192_v52  ;;  %v1391_v61 = vadd.f32 %v2298_v10, %v1256_v53  ;;  %v1878_v62 = vpop.f32.mrf.mxu0  ;;  %v1942_v63 = vpop.f32.mrf.mxu1 }
 0x13f   :  { %1578 = vst [vmem:[%s2954_s4 + $0x148] sm:$0xff] %v1450_v56  ;;  %1642 = vst [vmem:[%s2954_s4 + $0x348] sm:$0xff] %v1514_v57  ;;  %v1325_v0 = vadd.f32 %v2298_v10, %v1190_v58  ;;  %v1389_v1 = vadd.f32 %v2298_v10, %v1254_v59  ;;  %v1193_v2 = vmul.f32 %v1878_v62, %v2293_v8 }
 0x140   :  { %v1257_v3 = vmul.f32 %v1942_v63, %v2293_v8  ;;  %v1455_v4 = vmax.f32 %v1327_v60, 0.0  ;;  %v1519_v5 = vmax.f32 %v1391_v61, 0.0  ;;  %v807_v6 = vpop.f32.mrf.mxu0  ;;  %v1063_v7 = vpop.f32.mrf.mxu1 }
 0x141   :  { %v1453_v9 = vmax.f32 %v1325_v0, 0.0  ;;  %v1517_v11 = vmax.f32 %v1389_v1, 0.0  ;;  %v1328_v12 = vadd.f32 %v2298_v10, %v1193_v2  ;;  %v1191_v14 = vmul.f32 %v2293_v8, %v807_v6 }
 0x142   :  { %v1392_v13 = vadd.f32 %v2298_v10, %v1257_v3  ;;  %1583 = vst [vmem:[%s2954_s4 + $0x170] sm:$0xff] %v1455_v4  ;;  %1647 = vst [vmem:[%s2954_s4 + $0x370] sm:$0xff] %v1519_v5  ;;  %v1255_v15 = vmul.f32 %v2293_v8, %v1063_v7  ;;  %v1881_v16 = vpop.f32.mrf.mxu0  ;;  %v1945_v17 = vpop.f32.mrf.mxu1 }
 0x143   :  { %1581 = vst [vmem:[%s2954_s4 + $0x160] sm:$0xff] %v1453_v9  ;;  %1645 = vst [vmem:[%s2954_s4 + $0x360] sm:$0xff] %v1517_v11  ;;  %v1456_v18 = vmax.f32 %v1328_v12, 0.0  ;;  %v1196_v20 = vmul.f32 %v1881_v16, %v2293_v8  ;;  %v1260_v21 = vmul.f32 %v1945_v17, %v2293_v8  ;;  %v1326_v22 = vadd.f32 %v2298_v10, %v1191_v14 }
 0x144   :  { %v1520_v19 = vmax.f32 %v1392_v13, 0.0  ;;  %v1390_v23 = vadd.f32 %v2298_v10, %v1255_v15  ;;  %v820_v24 = vpop.f32.mrf.mxu0  ;;  %v1076_v25 = vpop.f32.mrf.mxu1 }
 0x145   :  { %1584 = vst [vmem:[%s2954_s4 + $0x178] sm:$0xff] %v1456_v18  ;;  %v1331_v26 = vadd.f32 %v2298_v10, %v1196_v20  ;;  %v1395_v27 = vadd.f32 %v2298_v10, %v1260_v21  ;;  %v1194_v28 = vmul.f32 %v2293_v8, %v820_v24  ;;  %v1258_v29 = vmul.f32 %v2293_v8, %v1076_v25 }
 0x146   :  { %1648 = vst [vmem:[%s2954_s4 + $0x378] sm:$0xff] %v1520_v19  ;;  %v1454_v30 = vmax.f32 %v1326_v22, 0.0  ;;  %v1518_v31 = vmax.f32 %v1390_v23, 0.0  ;;  %v1882_v32 = vpop.f32.mrf.mxu0  ;;  %v1946_v33 = vpop.f32.mrf.mxu1 }
 0x147   :  { %v1459_v34 = vmax.f32 %v1331_v26, 0.0  ;;  %v1523_v35 = vmax.f32 %v1395_v27, 0.0  ;;  %v1329_v36 = vadd.f32 %v2298_v10, %v1194_v28  ;;  %v1393_v37 = vadd.f32 %v2298_v10, %v1258_v29 }
 0x148   :  { %1582 = vst [vmem:[%s2954_s4 + $0x168] sm:$0xff] %v1454_v30  ;;  %1646 = vst [vmem:[%s2954_s4 + $0x368] sm:$0xff] %v1518_v31  ;;  %v1197_v38 = vmul.f32 %v1882_v32, %v2293_v8  ;;  %v1261_v39 = vmul.f32 %v1946_v33, %v2293_v8  ;;  %v823_v40 = vpop.f32.mrf.mxu0  ;;  %v1079_v41 = vpop.f32.mrf.mxu1 }
 0x149   :  { %1587 = vst [vmem:[%s2954_s4 + $0x190] sm:$0xff] %v1459_v34  ;;  %1651 = vst [vmem:[%s2954_s4 + $0x390] sm:$0xff] %v1523_v35  ;;  %v1457_v42 = vmax.f32 %v1329_v36, 0.0  ;;  %v1521_v43 = vmax.f32 %v1393_v37, 0.0  ;;  %v1195_v44 = vmul.f32 %v2293_v8, %v823_v40  ;;  %v1259_v45 = vmul.f32 %v2293_v8, %v1079_v41 }
 0x14a   :  { %v1332_v46 = vadd.f32 %v2298_v10, %v1197_v38  ;;  %v1396_v47 = vadd.f32 %v2298_v10, %v1261_v39  ;;  %v1885_v48 = vpop.f32.mrf.mxu0  ;;  %v1949_v49 = vpop.f32.mrf.mxu1  ;;  %v2816_v10 = vld [vmem:[%s2952_s2] ss:$0 sm:$0xff] }
 0x14b   :  { %1585 = vst [vmem:[%s2954_s4 + $0x180] sm:$0xff] %v1457_v42  ;;  %1649 = vst [vmem:[%s2954_s4 + $0x380] sm:$0xff] %v1521_v43  ;;  %v1330_v8 = vadd.f32 %v2809_v50, %v1195_v44  ;;  %v1394_v51 = vadd.f32 %v2809_v50, %v1259_v45  ;;  %v1200_v52 = vmul.f32 %v2816_v10, %v1885_v48 }
 0x14c   :  { %v1264_v53 = vmul.f32 %v2816_v10, %v1949_v49  ;;  %v1460_v54 = vmax.f32 %v1332_v46, 0.0  ;;  %v1524_v55 = vmax.f32 %v1396_v47, 0.0  ;;  %v836_v56 = vpop.f32.mrf.mxu0  ;;  %v1092_v57 = vpop.f32.mrf.mxu1 }
 0x14d   :  { %v1458_v58 = vmax.f32 %v1330_v8, 0.0  ;;  %v1522_v59 = vmax.f32 %v1394_v51, 0.0  ;;  %v1335_v60 = vadd.f32 %v2809_v50, %v1200_v52  ;;  %v1198_v62 = vmul.f32 %v2816_v10, %v836_v56 }
 0x14e   :  { %v1399_v61 = vadd.f32 %v2809_v50, %v1264_v53  ;;  %1588 = vst [vmem:[%s2954_s4 + $0x198] sm:$0xff] %v1460_v54  ;;  %1652 = vst [vmem:[%s2954_s4 + $0x398] sm:$0xff] %v1524_v55  ;;  %v1262_v63 = vmul.f32 %v2816_v10, %v1092_v57  ;;  %v1886_v0 = vpop.f32.mrf.mxu0  ;;  %v1950_v1 = vpop.f32.mrf.mxu1 }
 0x14f   :  { %1586 = vst [vmem:[%s2954_s4 + $0x188] sm:$0xff] %v1458_v58  ;;  %1650 = vst [vmem:[%s2954_s4 + $0x388] sm:$0xff] %v1522_v59  ;;  %v1463_v2 = vmax.f32 %v1335_v60, 0.0  ;;  %v1201_v4 = vmul.f32 %v2816_v10, %v1886_v0  ;;  %v1265_v5 = vmul.f32 %v2816_v10, %v1950_v1  ;;  %v1333_v6 = vadd.f32 %v2809_v50, %v1198_v62 }
 0x150   :  { %v1527_v3 = vmax.f32 %v1399_v61, 0.0  ;;  %v1397_v7 = vadd.f32 %v2809_v50, %v1262_v63  ;;  %v839_v9 = vpop.f32.mrf.mxu0  ;;  %v1095_v11 = vpop.f32.mrf.mxu1 }
 0x151   :  { %1591 = vst [vmem:[%s2954_s4 + $0x1b0] sm:$0xff] %v1463_v2  ;;  %v1336_v12 = vadd.f32 %v2809_v50, %v1201_v4  ;;  %v1400_v13 = vadd.f32 %v2809_v50, %v1265_v5  ;;  %v1199_v14 = vmul.f32 %v2816_v10, %v839_v9  ;;  %v1263_v15 = vmul.f32 %v2816_v10, %v1095_v11 }
 0x152   :  { %1655 = vst [vmem:[%s2954_s4 + $0x3b0] sm:$0xff] %v1527_v3  ;;  %v1461_v16 = vmax.f32 %v1333_v6, 0.0  ;;  %v1525_v17 = vmax.f32 %v1397_v7, 0.0  ;;  %v1889_v18 = vpop.f32.mrf.mxu0  ;;  %v1953_v19 = vpop.f32.mrf.mxu1 }
 0x153   :  { %v1464_v20 = vmax.f32 %v1336_v12, 0.0  ;;  %v1528_v21 = vmax.f32 %v1400_v13, 0.0  ;;  %v1334_v22 = vadd.f32 %v2809_v50, %v1199_v14  ;;  %v1398_v23 = vadd.f32 %v2809_v50, %v1263_v15 }
 0x154   :  { %1589 = vst [vmem:[%s2954_s4 + $0x1a0] sm:$0xff] %v1461_v16  ;;  %1653 = vst [vmem:[%s2954_s4 + $0x3a0] sm:$0xff] %v1525_v17  ;;  %v1204_v24 = vmul.f32 %v2816_v10, %v1889_v18  ;;  %v1268_v25 = vmul.f32 %v2816_v10, %v1953_v19  ;;  %v852_v26 = vpop.f32.mrf.mxu0  ;;  %v1108_v27 = vpop.f32.mrf.mxu1 }
 0x155   :  { %1592 = vst [vmem:[%s2954_s4 + $0x1b8] sm:$0xff] %v1464_v20  ;;  %1656 = vst [vmem:[%s2954_s4 + $0x3b8] sm:$0xff] %v1528_v21  ;;  %v1462_v28 = vmax.f32 %v1334_v22, 0.0  ;;  %v1526_v29 = vmax.f32 %v1398_v23, 0.0  ;;  %v1202_v30 = vmul.f32 %v2816_v10, %v852_v26  ;;  %v1266_v31 = vmul.f32 %v2816_v10, %v1108_v27 }
 0x156   :  { %v1339_v32 = vadd.f32 %v2809_v50, %v1204_v24  ;;  %v1403_v33 = vadd.f32 %v2809_v50, %v1268_v25  ;;  %v1890_v34 = vpop.f32.mrf.mxu0  ;;  %v1954_v35 = vpop.f32.mrf.mxu1 }
 0x157   :  { %1590 = vst [vmem:[%s2954_s4 + $0x1a8] sm:$0xff] %v1462_v28  ;;  %1654 = vst [vmem:[%s2954_s4 + $0x3a8] sm:$0xff] %v1526_v29  ;;  %v1337_v36 = vadd.f32 %v2809_v50, %v1202_v30  ;;  %v1401_v37 = vadd.f32 %v2809_v50, %v1266_v31  ;;  %v1205_v38 = vmul.f32 %v2816_v10, %v1890_v34 }
 0x158   :  { %v1269_v39 = vmul.f32 %v2816_v10, %v1954_v35  ;;  %v1467_v40 = vmax.f32 %v1339_v32, 0.0  ;;  %v1531_v41 = vmax.f32 %v1403_v33, 0.0  ;;  %v855_v42 = vpop.f32.mrf.mxu0  ;;  %v1111_v43 = vpop.f32.mrf.mxu1 }
 0x159   :  { %v1465_v44 = vmax.f32 %v1337_v36, 0.0  ;;  %v1529_v45 = vmax.f32 %v1401_v37, 0.0  ;;  %v1340_v46 = vadd.f32 %v2809_v50, %v1205_v38  ;;  %v1203_v48 = vmul.f32 %v2816_v10, %v855_v42 }
 0x15a   :  { %v1404_v47 = vadd.f32 %v2809_v50, %v1269_v39  ;;  %1595 = vst [vmem:[%s2954_s4 + $0x1d0] sm:$0xff] %v1467_v40  ;;  %1659 = vst [vmem:[%s2954_s4 + $0x3d0] sm:$0xff] %v1531_v41  ;;  %v1267_v49 = vmul.f32 %v2816_v10, %v1111_v43  ;;  %v1893_v8 = vpop.f32.mrf.mxu0  ;;  %v1957_v51 = vpop.f32.mrf.mxu1 }
 0x15b   :  { %1593 = vst [vmem:[%s2954_s4 + $0x1c0] sm:$0xff] %v1465_v44  ;;  %1657 = vst [vmem:[%s2954_s4 + $0x3c0] sm:$0xff] %v1529_v45  ;;  %v1468_v52 = vmax.f32 %v1340_v46, 0.0  ;;  %v1208_v54 = vmul.f32 %v2816_v10, %v1893_v8  ;;  %v1272_v55 = vmul.f32 %v2816_v10, %v1957_v51  ;;  %v1338_v56 = vadd.f32 %v2809_v50, %v1203_v48 }
 0x15c   :  { %v1532_v53 = vmax.f32 %v1404_v47, 0.0  ;;  %v1402_v57 = vadd.f32 %v2809_v50, %v1267_v49  ;;  %v868_v58 = vpop.f32.mrf.mxu0  ;;  %v1124_v59 = vpop.f32.mrf.mxu1 }
 0x15d   :  { %1596 = vst [vmem:[%s2954_s4 + $0x1d8] sm:$0xff] %v1468_v52  ;;  %v1343_v60 = vadd.f32 %v2809_v50, %v1208_v54  ;;  %v1407_v61 = vadd.f32 %v2809_v50, %v1272_v55  ;;  %v1206_v62 = vmul.f32 %v2816_v10, %v868_v58  ;;  %v1270_v63 = vmul.f32 %v2816_v10, %v1124_v59 }
 0x15e   :  { %1660 = vst [vmem:[%s2954_s4 + $0x3d8] sm:$0xff] %v1532_v53  ;;  %v1466_v0 = vmax.f32 %v1338_v56, 0.0  ;;  %v1530_v1 = vmax.f32 %v1402_v57, 0.0  ;;  %v1894_v2 = vpop.f32.mrf.mxu0  ;;  %v1958_v3 = vpop.f32.mrf.mxu1 }
 0x15f   :  { %v1471_v4 = vmax.f32 %v1343_v60, 0.0  ;;  %v1535_v5 = vmax.f32 %v1407_v61, 0.0  ;;  %v1341_v6 = vadd.f32 %v2809_v50, %v1206_v62  ;;  %v1405_v7 = vadd.f32 %v2809_v50, %v1270_v63 }
 0x160   :  { %1594 = vst [vmem:[%s2954_s4 + $0x1c8] sm:$0xff] %v1466_v0  ;;  %1658 = vst [vmem:[%s2954_s4 + $0x3c8] sm:$0xff] %v1530_v1  ;;  %v1209_v9 = vmul.f32 %v2816_v10, %v1894_v2  ;;  %v1273_v11 = vmul.f32 %v2816_v10, %v1958_v3  ;;  %v871_v12 = vpop.f32.mrf.mxu0  ;;  %v1127_v13 = vpop.f32.mrf.mxu1 }
 0x161   :  { %1599 = vst [vmem:[%s2954_s4 + $0x1f0] sm:$0xff] %v1471_v4  ;;  %1663 = vst [vmem:[%s2954_s4 + $0x3f0] sm:$0xff] %v1535_v5  ;;  %v1469_v14 = vmax.f32 %v1341_v6, 0.0  ;;  %v1533_v15 = vmax.f32 %v1405_v7, 0.0  ;;  %v1207_v16 = vmul.f32 %v2816_v10, %v871_v12  ;;  %v1271_v17 = vmul.f32 %v2816_v10, %v1127_v13 }
 0x162   :  { %v1344_v18 = vadd.f32 %v2809_v50, %v1209_v9  ;;  %v1408_v19 = vadd.f32 %v2809_v50, %v1273_v11 }
 0x163   :  { %1597 = vst [vmem:[%s2954_s4 + $0x1e0] sm:$0xff] %v1469_v14  ;;  %1661 = vst [vmem:[%s2954_s4 + $0x3e0] sm:$0xff] %v1533_v15  ;;  %v1342_v20 = vadd.f32 %v2809_v50, %v1207_v16  ;;  %v1406_v21 = vadd.f32 %v2809_v50, %v1271_v17 }
 0x164   :  { %v1472_v22 = vmax.f32 %v1344_v18, 0.0  ;;  %v1536_v23 = vmax.f32 %v1408_v19, 0.0 }
 0x165   :  { %v1470_v24 = vmax.f32 %v1342_v20, 0.0  ;;  %v1534_v10 = vmax.f32 %v1406_v21, 0.0 }
 0x166   :  { %1600 = vst [vmem:[%s2954_s4 + $0x1f8] sm:$0xff] %v1472_v22  ;;  %1664 = vst [vmem:[%s2954_s4 + $0x3f8] sm:$0xff] %v1536_v23 }
 0x167   :  { %1598 = vst [vmem:[%s2954_s4 + $0x1e8] sm:$0xff] %v1470_v24  ;;  %1662 = vst [vmem:[%s2954_s4 + $0x3e8] sm:$0xff] %v1534_v10 }

</bundles_post_ra>
